<compile_context>
chip_gen: v7x
topology: tpu7x:2x2x1
jax: 0.10.0
libtpu: 0.0.40
codegen_flags: <defaults>
</compile_context>

<pallas_src>
import functools
import jax
import jax.numpy as jnp
from jax import lax
from jax.experimental import pallas as pl
from jax.experimental.pallas import tpu as pltpu

LANE = 128


def _up(n, m=LANE):
    return ((n + m - 1) // m) * m


def _pad2(w, rows, cols):
    return jnp.pad(w, ((0, rows - w.shape[0]), (0, cols - w.shape[1])))


def _pack3(vecs, cols):
    return jnp.stack([jnp.pad(v, (0, cols - v.shape[0])) for v in vecs], axis=0)


# ------------------------------ fused kernel --------------------------------

def _drugban_fused_kernel(
    # batch-tiled data
    adj_ref, nodes_ref, tok_ref,
    # drug extractor (MolecularGCN) weights
    init_w_ref, g1_w_ref, g1_b_ref, g2_w_ref, g2_b_ref,
    # protein extractor (ProteinCNN) weights
    emb_ref, c1_w_ref, c1_p_ref, c2_w_ref, c2_p_ref,
    # CAtt_pro1 bilinear projections
    u_ref, v_ref,
    # MLPDecoder weights
    m1_w_ref, m1_p_ref, m2_w_ref, m2_p_ref, m3_w_ref, m3_b_ref,
    # outputs
    score_ref, att_ref,
    # scratch
    dproj_scr,
    *, BB, N, L, K1, K2, HID):

    f32, bf16 = jnp.float32, jnp.bfloat16
    HP = u_ref.shape[-1]
    NP = dproj_scr.shape[1]

    # ---------------- drug branch: MolecularGCN ----------------
    adjb = adj_ref[...].astype(bf16)                       # adjacency cast ONCE
    h = jnp.dot(nodes_ref[...].reshape(BB * N, -1).astype(bf16), init_w_ref[...],
                preferred_element_type=f32)                # init_transform (no bias)

    def gcn_layer(h2d, w_ref, b_ref):
        hw = jnp.dot(h2d.astype(bf16), w_ref[...], preferred_element_type=f32)
        ah = jnp.einsum('bij,bjf->bif', adjb,
                        hw.reshape(BB, N, hw.shape[-1]).astype(bf16),
                        preferred_element_type=f32)        # A_hat @ (H @ W) per graph
        return jnp.maximum(ah.reshape(BB * N, ah.shape[-1]) + b_ref[...], 0.0)

    h = gcn_layer(h, g1_w_ref, g1_b_ref)
    vd2 = gcn_layer(h, g2_w_ref, g2_b_ref)                 # (BB*N, D2P) f32

    # Project drug features for the bilinear attention now and park the result
    # in an explicit bf16 VMEM scratch so only (BB, NP, HP) stays live across
    # the long protein-CNN section (bounds the footprint on v7x's 64 MiB VMEM).
    dproj = jnp.dot(vd2.astype(bf16), v_ref[...],
                    preferred_element_type=f32).reshape(BB, N, HP)
    if NP > N:                                             # zero-pad atoms to a lane-dense NP
        dproj = jnp.concatenate(
            [dproj, jnp.zeros((BB, NP - N, HP), f32)], axis=1)
    dproj_scr[...] = dproj.astype(bf16)

    # ---------------- protein branch: ProteinCNN ----------------
    # Embedding lookup as a one-hot MXU matmul; tokens arrive lane-major (BB,1,L),
    # the one-hot is built with a sublane iota compare then a tiny minor-dims
    # transpose (XLU) to the (BB*L, VOC) matmul orientation.
    VOC = emb_ref.shape[0]
    oh_t = (lax.broadcasted_iota(jnp.int32, (BB, VOC, L), 1)
            == tok_ref[...]).astype(f32)                   # (BB, VOC, L)
    onehot = jnp.swapaxes(oh_t, 1, 2).reshape(BB * L, VOC).astype(bf16)
    x = jnp.dot(onehot, emb_ref[...], preferred_element_type=f32)   # (BB*L, PEP)

    # in-sequence position computed in-kernel (no HBM pos input)
    pos = lax.broadcasted_iota(jnp.int32, (BB, L, 1), 1).reshape(BB * L, 1)

    def conv_relu_bn(x2d, K, w_ref, p_ref):
        # 'same'-padded Conv1d fused into ONE deep-K matmul: the K shifted &
        # edge-masked taps are concatenated along the feature axis so the MXU
        # contraction depth is K*Cin (no per-tap VALU accumulation).  Rolled
        # rows that wrap across samples land exactly on masked positions.
        left, BL = K // 2, x2d.shape[0]
        taps = []
        for k in range(K):
            d = k - left
            if d == 0:
                tap = x2d
            else:
                rolled = pltpu.roll(x2d, shift=(-d) % BL, axis=0)   # XLU slot
                valid = jnp.logical_and(pos + d >= 0, pos + d < L)
                tap = jnp.where(valid, rolled, 0.0)
            taps.append(tap.astype(bf16))
        xk = jnp.concatenate(taps, axis=-1)                # (BL, K*Cin) bf16
        y = jnp.dot(xk, w_ref[...], preferred_element_type=f32)
        y = jnp.maximum(y + p_ref[0:1, :], 0.0)            # conv bias -> ReLU
        return y * p_ref[1:2, :] + p_ref[2:3, :]           # BatchNorm1d (eval), fused

    x = conv_relu_bn(x, K1, c1_w_ref, c1_p_ref)
    vp2 = conv_relu_bn(x, K2, c2_w_ref, c2_p_ref)          # (BB*L, F2P) f32

    # ------ CAtt_pro1 / SorCAtt (bilinear cross-attention, SF=True, PE='') ------
    pproj = jnp.dot(vp2.astype(bf16), u_ref[...],
                    preferred_element_type=f32).reshape(BB, L, HP)
    pprojb = pproj.astype(bf16)
    dprojb = dproj_scr[...]                                # (BB, NP, HP) bf16

    s = jnp.einsum('bqh,bkh->bqk', pprojb, dprojb,
                   preferred_element_type=f32) * (1.0 / float(HID) ** 0.5)
    if NP > N:                                             # mask padded atom columns
        col = lax.broadcasted_iota(jnp.int32, (BB, L, NP), 2)
        s = jnp.where(col < N, s, jnp.float32(-1e30))
    # TODO(synk): SorCAtt source unavailable; BAN-style joint softmax over (L, N).
    m = jnp.max(jnp.max(s, axis=2, keepdims=True), axis=1, keepdims=True)
    e = jnp.exp(s - m)                                     # f32 exp (v5e-safe; bf16 is an option on v6e/v7x)
    denom = jnp.sum(jnp.sum(e, axis=2, keepdims=True), axis=1, keepdims=True)
    att = e / denom                                        # exact normalization (padded cols are exact 0)
    tmp = jnp.einsum('bqk,bkh->bqh', att.astype(bf16), dprojb,
                     preferred_element_type=f32)
    feat = jnp.sum(pproj * tmp, axis=1)                    # (BB, HP) pooled bilinear feature

    # ---------------- MLPDecoder ----------------
    h1 = jnp.dot(feat.astype(bf16), m1_w_ref[...], preferred_element_type=f32)
    h1 = jnp.maximum(h1 + m1_p_ref[0:1, :], 0.0) * m1_p_ref[1:2, :] + m1_p_ref[2:3, :]
    h2 = jnp.dot(h1.astype(bf16), m2_w_ref[...], preferred_element_type=f32)
    h2 = jnp.maximum(h2 + m2_p_ref[0:1, :], 0.0) * m2_p_ref[1:2, :] + m2_p_ref[2:3, :]
    score = jnp.dot(h2.astype(bf16), m3_w_ref[...],
                    preferred_element_type=f32) + m3_b_ref[...]

    score_ref[...] = score.reshape(BB, 1, score.shape[-1])
    att_ref[...] = att                                     # lane-dense (BB, L, NP) store


# ----------------------------- parameter setup ------------------------------

def bn_eval_scale_shift(dim, eps=1e-5):
    gamma = jnp.ones((dim,), jnp.float32)
    beta = jnp.zeros((dim,), jnp.float32)
    running_mean = jnp.zeros((dim,), jnp.float32)
    running_var = jnp.ones((dim,), jnp.float32)
    scale = gamma / jnp.sqrt(running_var + eps)
    shift = beta - running_mean * scale
    return scale, shift


def init_params(key, cfg):
    ks = iter(jax.random.split(key, 32))
    rnd = lambda shape: 0.1 * jax.random.normal(next(ks), shape, jnp.float32)

    params = {}
    # MolecularGCN.init_transform (no bias); padding=True -> last output column zeroed
    w = rnd((cfg["node_in_feats"], cfg["node_embed"]))
    params["init_w"] = w.at[:, -1].set(0.0)                # torch weight[-1].fill_(0)

    gcn = []
    fin = cfg["node_embed"]
    for fout in cfg["drug_hidden"]:
        gcn.append((rnd((fin, fout)), rnd((fout,))))
        fin = fout
    params["gcn"] = gcn

    emb = rnd((26, cfg["prot_embed"]))
    params["prot_emb"] = emb.at[0].set(0.0)                # padding_idx=0
    cnn = []
    cin = cfg["prot_embed"]
    for cout, k in zip(cfg["num_filters"], cfg["kernel_size"]):
        s, t = bn_eval_scale_shift(cout)
        cnn.append((rnd((k, cin, cout)), rnd((cout,)), s, t))
        cin = cout
    params["cnn"] = cnn

    params["ban_u"] = rnd((cfg["num_filters"][-1], cfg["hid_dim"]))
    params["ban_v"] = rnd((cfg["drug_hidden"][-1], cfg["hid_dim"]))

    s1, t1 = bn_eval_scale_shift(cfg["mlp_hidden"])
    s2, t2 = bn_eval_scale_shift(cfg["mlp_out"])
    params["mlp"] = dict(
        w1=rnd((cfg["mlp_in"], cfg["mlp_hidden"])), b1=rnd((cfg["mlp_hidden"],)),
        s1=s1, t1=t1,
        w2=rnd((cfg["mlp_hidden"], cfg["mlp_out"])), b2=rnd((cfg["mlp_out"],)),
        s2=s2, t2=t2,
        w3=rnd((cfg["mlp_out"], cfg["mlp_binary"])), b3=rnd((cfg["mlp_binary"],)),
    )
    return params


def pack_params(p):
    """Zero-pad channel dims to lane multiples of 128, cast matmul weights to
    bf16, fuse conv taps along K*Cin and pack (bias, bn-scale, bn-shift)."""
    bf16 = jnp.bfloat16
    g1_w, g1_b = p["gcn"][0]
    g2_w, g2_b = p["gcn"][1]
    c1_w, c1_b, c1_s, c1_t = p["cnn"][0]
    c2_w, c2_b, c2_s, c2_t = p["cnn"][1]
    mp = p["mlp"]

    Fin, E = p["init_w"].shape
    D1, D2 = g1_w.shape[1], g2_w.shape[1]
    PE = p["prot_emb"].shape[1]
    F1, F2 = c1_w.shape[2], c2_w.shape[2]
    H = p["ban_u"].shape[1]
    M1, M2, O = mp["w1"].shape[1], mp["w2"].shape[1], mp["w3"].shape[1]

    FinP, EP, D1P, D2P = _up(Fin), _up(E), _up(D1), _up(D2)
    PEP, F1P, F2P, HP = _up(PE), _up(F1), _up(F2), _up(H)
    M1P, M2P, OP = _up(M1), _up(M2), _up(O)
    VOC = 32                                               # 26-token vocab -> 32-wide one-hot

    def conv_w(w, cinp, coutp):
        K = w.shape[0]
        w = jnp.pad(w, ((0, 0), (0, cinp - w.shape[1]), (0, coutp - w.shape[2])))
        return w.reshape(K * cinp, coutp).astype(bf16)     # taps fused along K*Cin

    return dict(
        init_w=_pad2(p["init_w"], FinP, EP).astype(bf16),
        g1_w=_pad2(g1_w, EP, D1P).astype(bf16),
        g1_b=jnp.pad(g1_b, (0, D1P - D1)).reshape(1, D1P),
        g2_w=_pad2(g2_w, D1P, D2P).astype(bf16),
        g2_b=jnp.pad(g2_b, (0, D2P - D2)).reshape(1, D2P),
        emb=_pad2(p["prot_emb"], VOC, PEP).astype(bf16),
        c1_w=conv_w(c1_w, PEP, F1P),
        c1_p=_pack3([c1_b, c1_s, c1_t], F1P),
        c2_w=conv_w(c2_w, F1P, F2P),
        c2_p=_pack3([c2_b, c2_s, c2_t], F2P),
        u=_pad2(p["ban_u"], F2P, HP).astype(bf16),
        v=_pad2(p["ban_v"], D2P, HP).astype(bf16),
        m1_w=_pad2(mp["w1"], HP, M1P).astype(bf16),
        m1_p=_pack3([mp["b1"], mp["s1"], mp["t1"]], M1P),
        m2_w=_pad2(mp["w2"], M1P, M2P).astype(bf16),
        m2_p=_pack3([mp["b2"], mp["s2"], mp["t2"]], M2P),
        m3_w=_pad2(mp["w3"], M2P, OP).astype(bf16),
        m3_b=jnp.pad(mp["b3"], (0, OP - O)).reshape(1, OP),
    )


# ----------------------------- DrugBAN forward ------------------------------

def drugban_forward(packed, adj_norm, node_feats, prot_tokens, *,
                    hid_dim, out_dim, b_blk=1):
    B, N, Fin = node_feats.shape
    L = prot_tokens.shape[1]
    assert B % b_blk == 0

    FinP = packed["init_w"].shape[0]
    EP = packed["init_w"].shape[1]
    D1P = packed["g1_w"].shape[1]
    D2P = packed["g2_w"].shape[1]
    VOC, PEP = packed["emb"].shape
    F1P = packed["c1_w"].shape[1]
    F2P = packed["c2_w"].shape[1]
    K1 = packed["c1_w"].shape[0] // PEP
    K2 = packed["c2_w"].shape[0] // F1P
    HP = packed["u"].shape[1]
    M1P = packed["m1_w"].shape[1]
    M2P = packed["m2_w"].shape[1]
    OP = packed["m3_w"].shape[1]
    NP = _up(N)

    nodes = jnp.pad(node_feats, ((0, 0), (0, 0), (0, FinP - Fin)))
    tok = prot_tokens.astype(jnp.int32).reshape(B, 1, L)   # lane-major token stream

    weights = [packed[k] for k in (
        "init_w", "g1_w", "g1_b", "g2_w", "g2_b",
        "emb", "c1_w", "c1_p", "c2_w", "c2_p",
        "u", "v",
        "m1_w", "m1_p", "m2_w", "m2_p", "m3_w", "m3_b")]
    args = (adj_norm, nodes, tok, *weights)

    def data_spec(a):
        return pl.BlockSpec((b_blk,) + a.shape[1:], lambda b: (b, 0, 0))

    def weight_spec(a):
        nd = a.ndim
        return pl.BlockSpec(a.shape, lambda b, _nd=nd: (0,) * _nd)

    in_specs = [data_spec(adj_norm), data_spec(nodes), data_spec(tok)]
    in_specs += [weight_spec(w) for w in weights]

    # VMEM budget: double-buffered batch blocks + resident weights + scratch,
    # with ~4x slack for in-kernel temporaries; clamped for v7x's 64 MiB VMEM.
    nbytes = lambda a: a.size * a.dtype.itemsize
    blk_bytes = b_blk * (N * N * 4 + N * FinP * 4 + L * 4 + OP * 4 + L * NP * 4)
    vmem_limit = int(min(max(4 * (2 * blk_bytes + sum(map(nbytes, weights))
                                  + b_blk * NP * HP * 2), 32 << 20), 64 << 20))

    mm = (N * (FinP * EP + EP * D1P + N * D1P + D1P * D2P + N * D2P + D2P * HP)
          + L * (VOC * PEP + K1 * PEP * F1P + K2 * F1P * F2P
                 + F2P * HP + 2 * NP * HP)
          + HP * M1P + M1P * M2P + M2P * OP)
    cost = pl.CostEstimate(
        flops=int(2 * B * mm),
        transcendentals=int(B * L * NP),
        bytes_accessed=int(sum(map(nbytes, args)) + B * OP * 4 + B * L * NP * 4))

    score_p, att_p = pl.pallas_call(
        functools.partial(_drugban_fused_kernel, BB=b_blk, N=N, L=L,
                          K1=K1, K2=K2, HID=hid_dim),
        out_shape=(jax.ShapeDtypeStruct((B, 1, OP), jnp.float32),
                   jax.ShapeDtypeStruct((B, L, NP), jnp.float32)),
        grid=(B // b_blk,),
        in_specs=in_specs,
        out_specs=(pl.BlockSpec((b_blk, 1, OP), lambda b: (b, 0, 0)),
                   pl.BlockSpec((b_blk, L, NP), lambda b: (b, 0, 0))),
        scratch_shapes=[pltpu.VMEM((b_blk, NP, HP), jnp.bfloat16)],
        compiler_params=pltpu.CompilerParams(
            dimension_semantics=("parallel",),             # megacore-shard the batch (v7x)
            vmem_limit_bytes=vmem_limit),
        cost_estimate=cost,
    )(*args)

    # Undo the lane-dense padding in the wrapper (pure layout plumbing).
    return score_p[:, 0, :out_dim], att_p[:, :, :N]


# ----------------------------------- main -----------------------------------

if __name__ == "__main__":
    cfg = dict(
        node_in_feats=16, node_embed=32, drug_hidden=[32, 32],
        prot_embed=32, num_filters=[32, 32], kernel_size=[3, 5],
        hid_dim=32, mlp_in=32, mlp_hidden=64, mlp_out=32, mlp_binary=1,
    )
    B, N_atoms, L_prot = 2, 8, 16

    key = jax.random.PRNGKey(0)
    k_param, k_adj, k_node, k_tok = jax.random.split(key, 4)
    params = init_params(k_param, cfg)
    packed = pack_params(params)

    # synthetic batched drug graph: symmetric adjacency + self-loops, sym-normalized
    a = (jax.random.uniform(k_adj, (B, N_atoms, N_atoms)) > 0.5).astype(jnp.float32)
    a = jnp.maximum(a, jnp.swapaxes(a, 1, 2))
    a = a + jnp.eye(N_atoms, dtype=jnp.float32)[None]
    deg = jnp.sum(a, axis=-1)
    dinv = 1.0 / jnp.sqrt(deg)
    adj_norm = a * dinv[:, :, None] * dinv[:, None, :]

    node_feats = jax.random.normal(k_node, (B, N_atoms, cfg["node_in_feats"]),
                                   jnp.float32)
    prot_tokens = jax.random.randint(k_tok, (B, L_prot), 1, 26, dtype=jnp.int32)

    fwd = jax.jit(functools.partial(drugban_forward,
                                    hid_dim=cfg["hid_dim"],
                                    out_dim=cfg["mlp_binary"],
                                    b_blk=1))
    score, att1 = fwd(packed, adj_norm, node_feats, prot_tokens)
    jax.block_until_ready(score)
    jax.block_until_ready(att1)
    assert score.shape == (B, cfg["mlp_binary"])
    assert att1.shape == (B, L_prot, N_atoms)
    assert bool(jnp.isfinite(score).all()) and bool(jnp.isfinite(att1).all())
    print("KERNEL_OK")
</pallas_src>

<mosaic_0001>
module attributes {stable_mosaic.version = 11 : i64} {
  func.func @_drugban_fused_kernel(%arg0: i32, %arg1: memref<1x8x8xf32, #tpu.memory_space<vmem>>, %arg2: memref<1x8x128xf32, #tpu.memory_space<vmem>>, %arg3: memref<1x1x16xi32, #tpu.memory_space<vmem>>, %arg4: memref<128x128xbf16, #tpu.memory_space<vmem>>, %arg5: memref<128x128xbf16, #tpu.memory_space<vmem>>, %arg6: memref<1x128xf32, #tpu.memory_space<vmem>>, %arg7: memref<128x128xbf16, #tpu.memory_space<vmem>>, %arg8: memref<1x128xf32, #tpu.memory_space<vmem>>, %arg9: memref<32x128xbf16, #tpu.memory_space<vmem>>, %arg10: memref<384x128xbf16, #tpu.memory_space<vmem>>, %arg11: memref<3x128xf32, #tpu.memory_space<vmem>>, %arg12: memref<640x128xbf16, #tpu.memory_space<vmem>>, %arg13: memref<3x128xf32, #tpu.memory_space<vmem>>, %arg14: memref<128x128xbf16, #tpu.memory_space<vmem>>, %arg15: memref<128x128xbf16, #tpu.memory_space<vmem>>, %arg16: memref<128x128xbf16, #tpu.memory_space<vmem>>, %arg17: memref<3x128xf32, #tpu.memory_space<vmem>>, %arg18: memref<128x128xbf16, #tpu.memory_space<vmem>>, %arg19: memref<3x128xf32, #tpu.memory_space<vmem>>, %arg20: memref<128x128xbf16, #tpu.memory_space<vmem>>, %arg21: memref<1x128xf32, #tpu.memory_space<vmem>>, %arg22: memref<1x1x128xf32, #tpu.memory_space<vmem>>, %arg23: memref<1x16x128xf32, #tpu.memory_space<vmem>>, %arg24: memref<1x128x128xbf16, #tpu.memory_space<vmem>>) attributes {dimension_semantics = [#tpu.dimension_semantics<parallel>], iteration_bounds = array<i64: 2>, scalar_prefetch = 0 : i64, scratch_operands = 1 : i64, tpu.core_type = #tpu.core_type<tc>, window_params = [{transform_indices = @transform_0, window_bounds = array<i64: 1, 8, 8>}, {transform_indices = @transform_1, window_bounds = array<i64: 1, 8, 128>}, {transform_indices = @transform_2, window_bounds = array<i64: 1, 1, 16>}, {pipeline_mode = #tpu.pipeline_mode<synchronous>, transform_indices = @transform_3, window_bounds = array<i64: 128, 128>}, {pipeline_mode = #tpu.pipeline_mode<synchronous>, transform_indices = @transform_4, window_bounds = array<i64: 128, 128>}, {pipeline_mode = #tpu.pipeline_mode<synchronous>, transform_indices = @transform_5, window_bounds = array<i64: 1, 128>}, {pipeline_mode = #tpu.pipeline_mode<synchronous>, transform_indices = @transform_6, window_bounds = array<i64: 128, 128>}, {pipeline_mode = #tpu.pipeline_mode<synchronous>, transform_indices = @transform_7, window_bounds = array<i64: 1, 128>}, {pipeline_mode = #tpu.pipeline_mode<synchronous>, transform_indices = @transform_8, window_bounds = array<i64: 32, 128>}, {pipeline_mode = #tpu.pipeline_mode<synchronous>, transform_indices = @transform_9, window_bounds = array<i64: 384, 128>}, {pipeline_mode = #tpu.pipeline_mode<synchronous>, transform_indices = @transform_10, window_bounds = array<i64: 3, 128>}, {pipeline_mode = #tpu.pipeline_mode<synchronous>, transform_indices = @transform_11, window_bounds = array<i64: 640, 128>}, {pipeline_mode = #tpu.pipeline_mode<synchronous>, transform_indices = @transform_12, window_bounds = array<i64: 3, 128>}, {pipeline_mode = #tpu.pipeline_mode<synchronous>, transform_indices = @transform_13, window_bounds = array<i64: 128, 128>}, {pipeline_mode = #tpu.pipeline_mode<synchronous>, transform_indices = @transform_14, window_bounds = array<i64: 128, 128>}, {pipeline_mode = #tpu.pipeline_mode<synchronous>, transform_indices = @transform_15, window_bounds = array<i64: 128, 128>}, {pipeline_mode = #tpu.pipeline_mode<synchronous>, transform_indices = @transform_16, window_bounds = array<i64: 3, 128>}, {pipeline_mode = #tpu.pipeline_mode<synchronous>, transform_indices = @transform_17, window_bounds = array<i64: 128, 128>}, {pipeline_mode = #tpu.pipeline_mode<synchronous>, transform_indices = @transform_18, window_bounds = array<i64: 3, 128>}, {pipeline_mode = #tpu.pipeline_mode<synchronous>, transform_indices = @transform_19, window_bounds = array<i64: 128, 128>}, {pipeline_mode = #tpu.pipeline_mode<synchronous>, transform_indices = @transform_20, window_bounds = array<i64: 1, 128>}, {transform_indices = @transform_21, window_bounds = array<i64: 1, 1, 128>}, {transform_indices = @transform_22, window_bounds = array<i64: 1, 16, 128>}]} {
    %c0 = arith.constant 0 : index
    %c0_0 = arith.constant 0 : index
    %c0_1 = arith.constant 0 : index
    %0 = vector.load %arg1[%c0, %c0_0, %c0_1] : memref<1x8x8xf32, #tpu.memory_space<vmem>>, vector<1x8x8xf32>
    %1 = arith.truncf %0 : vector<1x8x8xf32> to vector<1x8x8xbf16>
    %c0_2 = arith.constant 0 : index
    %c0_3 = arith.constant 0 : index
    %c0_4 = arith.constant 0 : index
    %2 = vector.load %arg2[%c0_2, %c0_3, %c0_4] : memref<1x8x128xf32, #tpu.memory_space<vmem>>, vector<1x8x128xf32>
    %3 = vector.shape_cast %2 : vector<1x8x128xf32> to vector<8x128xf32>
    %4 = arith.truncf %3 : vector<8x128xf32> to vector<8x128xbf16>
    %c0_5 = arith.constant 0 : index
    %c0_6 = arith.constant 0 : index
    %5 = vector.load %arg4[%c0_5, %c0_6] : memref<128x128xbf16, #tpu.memory_space<vmem>>, vector<128x128xbf16>
    %cst = arith.constant dense<0.000000e+00> : vector<8x128xf32>
    %6 = tpu.matmul %4, %5, %cst {dimension_numbers = #tpu.dot_dimension_numbers<[1], [0], [0], [1], [0, 0, 1, 1], [], []>} : vector<8x128xbf16>, vector<128x128xbf16>, vector<8x128xf32> -> vector<8x128xf32>
    %7 = arith.truncf %6 : vector<8x128xf32> to vector<8x128xbf16>
    %c0_7 = arith.constant 0 : index
    %c0_8 = arith.constant 0 : index
    %8 = vector.load %arg5[%c0_7, %c0_8] : memref<128x128xbf16, #tpu.memory_space<vmem>>, vector<128x128xbf16>
    %cst_9 = arith.constant dense<0.000000e+00> : vector<8x128xf32>
    %9 = tpu.matmul %7, %8, %cst_9 {dimension_numbers = #tpu.dot_dimension_numbers<[1], [0], [0], [1], [0, 0, 1, 1], [], []>} : vector<8x128xbf16>, vector<128x128xbf16>, vector<8x128xf32> -> vector<8x128xf32>
    %10 = vector.shape_cast %9 : vector<8x128xf32> to vector<1x8x128xf32>
    %11 = arith.truncf %10 : vector<1x8x128xf32> to vector<1x8x128xbf16>
    "tpu.trace_start"() <{level = 10 : i32, message = "bij,bjf->bif"}> : () -> ()
    %cst_10 = arith.constant dense<0.000000e+00> : vector<1x8x128xf32>
    %12 = tpu.matmul %1, %11, %cst_10 {dimension_numbers = #tpu.dot_dimension_numbers<[2], [1], [1], [2], [0, 0, 0, 1, 1, 2], [0], [0]>} : vector<1x8x8xbf16>, vector<1x8x128xbf16>, vector<1x8x128xf32> -> vector<1x8x128xf32>
    "tpu.trace_stop"() : () -> ()
    %13 = vector.shape_cast %12 : vector<1x8x128xf32> to vector<8x128xf32>
    %c0_11 = arith.constant 0 : index
    %c0_12 = arith.constant 0 : index
    %14 = vector.load %arg6[%c0_11, %c0_12] : memref<1x128xf32, #tpu.memory_space<vmem>>, vector<1x128xf32>
    %15 = vector.broadcast %14 : vector<1x128xf32> to vector<8x128xf32>
    %16 = arith.addf %13, %15 : vector<8x128xf32>
    %cst_13 = arith.constant 0.000000e+00 : f32
    %17 = vector.broadcast %cst_13 : f32 to vector<8x128xf32>
    %18 = arith.maximumf %16, %17 : vector<8x128xf32>
    %19 = arith.truncf %18 : vector<8x128xf32> to vector<8x128xbf16>
    %c0_14 = arith.constant 0 : index
    %c0_15 = arith.constant 0 : index
    %20 = vector.load %arg7[%c0_14, %c0_15] : memref<128x128xbf16, #tpu.memory_space<vmem>>, vector<128x128xbf16>
    %cst_16 = arith.constant dense<0.000000e+00> : vector<8x128xf32>
    %21 = tpu.matmul %19, %20, %cst_16 {dimension_numbers = #tpu.dot_dimension_numbers<[1], [0], [0], [1], [0, 0, 1, 1], [], []>} : vector<8x128xbf16>, vector<128x128xbf16>, vector<8x128xf32> -> vector<8x128xf32>
    %22 = vector.shape_cast %21 : vector<8x128xf32> to vector<1x8x128xf32>
    %23 = arith.truncf %22 : vector<1x8x128xf32> to vector<1x8x128xbf16>
    "tpu.trace_start"() <{level = 10 : i32, message = "bij,bjf->bif"}> : () -> ()
    %cst_17 = arith.constant dense<0.000000e+00> : vector<1x8x128xf32>
    %24 = tpu.matmul %1, %23, %cst_17 {dimension_numbers = #tpu.dot_dimension_numbers<[2], [1], [1], [2], [0, 0, 0, 1, 1, 2], [0], [0]>} : vector<1x8x8xbf16>, vector<1x8x128xbf16>, vector<1x8x128xf32> -> vector<1x8x128xf32>
    "tpu.trace_stop"() : () -> ()
    %25 = vector.shape_cast %24 : vector<1x8x128xf32> to vector<8x128xf32>
    %c0_18 = arith.constant 0 : index
    %c0_19 = arith.constant 0 : index
    %26 = vector.load %arg8[%c0_18, %c0_19] : memref<1x128xf32, #tpu.memory_space<vmem>>, vector<1x128xf32>
    %27 = vector.broadcast %26 : vector<1x128xf32> to vector<8x128xf32>
    %28 = arith.addf %25, %27 : vector<8x128xf32>
    %cst_20 = arith.constant 0.000000e+00 : f32
    %29 = vector.broadcast %cst_20 : f32 to vector<8x128xf32>
    %30 = arith.maximumf %28, %29 : vector<8x128xf32>
    %31 = arith.truncf %30 : vector<8x128xf32> to vector<8x128xbf16>
    %c0_21 = arith.constant 0 : index
    %c0_22 = arith.constant 0 : index
    %32 = vector.load %arg15[%c0_21, %c0_22] : memref<128x128xbf16, #tpu.memory_space<vmem>>, vector<128x128xbf16>
    %cst_23 = arith.constant dense<0.000000e+00> : vector<8x128xf32>
    %33 = tpu.matmul %31, %32, %cst_23 {dimension_numbers = #tpu.dot_dimension_numbers<[1], [0], [0], [1], [0, 0, 1, 1], [], []>} : vector<8x128xbf16>, vector<128x128xbf16>, vector<8x128xf32> -> vector<8x128xf32>
    %34 = vector.shape_cast %33 : vector<8x128xf32> to vector<1x8x128xf32>
    %cst_24 = arith.constant 0.000000e+00 : f32
    %35 = vector.broadcast %cst_24 : f32 to vector<1x120x128xf32>
    %36 = tpu.concatenate %34, %35 in 1 : vector<1x8x128xf32>, vector<1x120x128xf32> -> vector<1x128x128xf32>
    %37 = arith.truncf %36 : vector<1x128x128xf32> to vector<1x128x128xbf16>
    %c0_25 = arith.constant 0 : index
    %c0_26 = arith.constant 0 : index
    %c0_27 = arith.constant 0 : index
    %38 = vector.load %arg24[%c0_25, %c0_26, %c0_27] : memref<1x128x128xbf16, #tpu.memory_space<vmem>>, vector<1x128x128xbf16>
    tpu.vector_store %arg24[%c0_25, %c0_26, %c0_27], %37 {strides = array<i32>} : memref<1x128x128xbf16, #tpu.memory_space<vmem>>, vector<1x128x128xbf16>,
    %39 = tpu.iota {dimensions = array<i32: 1>} : vector<1x32x16xi32>
    %c0_28 = arith.constant 0 : index
    %c0_29 = arith.constant 0 : index
    %c0_30 = arith.constant 0 : index
    %40 = vector.load %arg3[%c0_28, %c0_29, %c0_30] : memref<1x1x16xi32, #tpu.memory_space<vmem>>, vector<1x1x16xi32>
    %41 = vector.broadcast %40 : vector<1x1x16xi32> to vector<1x32x16xi32>
    %42 = arith.cmpi eq, %39, %41 : vector<1x32x16xi32>
    %43 = arith.extui %42 : vector<1x32x16xi1> to vector<1x32x16xi32>
    %44 = arith.sitofp %43 : vector<1x32x16xi32> to vector<1x32x16xf32>
    %45 = tpu.transpose %44, [0, 2, 1] : vector<1x32x16xf32> -> vector<1x16x32xf32>
    %46 = vector.shape_cast %45 : vector<1x16x32xf32> to vector<16x32xf32>
    %47 = arith.truncf %46 : vector<16x32xf32> to vector<16x32xbf16>
    %c0_31 = arith.constant 0 : index
    %c0_32 = arith.constant 0 : index
    %48 = vector.load %arg9[%c0_31, %c0_32] : memref<32x128xbf16, #tpu.memory_space<vmem>>, vector<32x128xbf16>
    %cst_33 = arith.constant dense<0.000000e+00> : vector<16x128xf32>
    %49 = tpu.matmul %47, %48, %cst_33 {dimension_numbers = #tpu.dot_dimension_numbers<[1], [0], [0], [1], [0, 0, 1, 1], [], []>} : vector<16x32xbf16>, vector<32x128xbf16>, vector<16x128xf32> -> vector<16x128xf32>
    %50 = tpu.iota {dimensions = array<i32: 1>} : vector<1x16x1xi32>
    %51 = vector.shape_cast %50 : vector<1x16x1xi32> to vector<16x1xi32>
    %c1_i32 = arith.constant 1 : i32
    %52 = tpu.dynamic_rotate %49 by %c1_i32 dim 0 : vector<16x128xf32>, i32 -> vector<16x128xf32>
    %c-1_i32 = arith.constant -1 : i32
    %53 = vector.broadcast %c-1_i32 : i32 to vector<16x1xi32>
    %54 = arith.addi %51, %53 : vector<16x1xi32>
    %c0_i32 = arith.constant 0 : i32
    %55 = vector.broadcast %c0_i32 : i32 to vector<16x1xi32>
    %56 = arith.cmpi sge, %54, %55 : vector<16x1xi32>
    %c-1_i32_34 = arith.constant -1 : i32
    %57 = vector.broadcast %c-1_i32_34 : i32 to vector<16x1xi32>
    %58 = arith.addi %51, %57 : vector<16x1xi32>
    %c16_i32 = arith.constant 16 : i32
    %59 = vector.broadcast %c16_i32 : i32 to vector<16x1xi32>
    %60 = arith.cmpi slt, %58, %59 : vector<16x1xi32>
    %61 = arith.andi %56, %60 : vector<16x1xi1>
    %cst_35 = arith.constant 0.000000e+00 : f32
    %62 = vector.shape_cast %61 : vector<16x1xi1> to vector<16x1xi1>
    %63 = vector.broadcast %62 : vector<16x1xi1> to vector<16x128xi1>
    %64 = vector.broadcast %cst_35 : f32 to vector<16x128xf32>
    %65 = arith.select %63, %52, %64 : vector<16x128xi1>, vector<16x128xf32>
    %66 = arith.truncf %65 : vector<16x128xf32> to vector<16x128xbf16>
    %67 = arith.truncf %49 : vector<16x128xf32> to vector<16x128xbf16>
    %c15_i32 = arith.constant 15 : i32
    %68 = tpu.dynamic_rotate %49 by %c15_i32 dim 0 : vector<16x128xf32>, i32 -> vector<16x128xf32>
    %c1_i32_36 = arith.constant 1 : i32
    %69 = vector.broadcast %c1_i32_36 : i32 to vector<16x1xi32>
    %70 = arith.addi %51, %69 : vector<16x1xi32>
    %c0_i32_37 = arith.constant 0 : i32
    %71 = vector.broadcast %c0_i32_37 : i32 to vector<16x1xi32>
    %72 = arith.cmpi sge, %70, %71 : vector<16x1xi32>
    %c1_i32_38 = arith.constant 1 : i32
    %73 = vector.broadcast %c1_i32_38 : i32 to vector<16x1xi32>
    %74 = arith.addi %51, %73 : vector<16x1xi32>
    %c16_i32_39 = arith.constant 16 : i32
    %75 = vector.broadcast %c16_i32_39 : i32 to vector<16x1xi32>
    %76 = arith.cmpi slt, %74, %75 : vector<16x1xi32>
    %77 = arith.andi %72, %76 : vector<16x1xi1>
    %cst_40 = arith.constant 0.000000e+00 : f32
    %78 = vector.shape_cast %77 : vector<16x1xi1> to vector<16x1xi1>
    %79 = vector.broadcast %78 : vector<16x1xi1> to vector<16x128xi1>
    %80 = vector.broadcast %cst_40 : f32 to vector<16x128xf32>
    %81 = arith.select %79, %68, %80 : vector<16x128xi1>, vector<16x128xf32>
    %82 = arith.truncf %81 : vector<16x128xf32> to vector<16x128xbf16>
    %83 = tpu.concatenate %66, %67, %82 in 1 : vector<16x128xbf16>, vector<16x128xbf16>, vector<16x128xbf16> -> vector<16x384xbf16>
    %c0_41 = arith.constant 0 : index
    %c0_42 = arith.constant 0 : index
    %84 = vector.load %arg10[%c0_41, %c0_42] : memref<384x128xbf16, #tpu.memory_space<vmem>>, vector<384x128xbf16>
    %cst_43 = arith.constant dense<0.000000e+00> : vector<16x128xf32>
    %85 = tpu.matmul %83, %84, %cst_43 {dimension_numbers = #tpu.dot_dimension_numbers<[1], [0], [0], [1], [0, 0, 1, 1], [], []>} : vector<16x384xbf16>, vector<384x128xbf16>, vector<16x128xf32> -> vector<16x128xf32>
    %c0_44 = arith.constant 0 : index
    %c0_45 = arith.constant 0 : index
    %86 = vector.load %arg11[%c0_44, %c0_45] : memref<3x128xf32, #tpu.memory_space<vmem>>, vector<1x128xf32>
    %87 = vector.broadcast %86 : vector<1x128xf32> to vector<16x128xf32>
    %88 = arith.addf %85, %87 : vector<16x128xf32>
    %cst_46 = arith.constant 0.000000e+00 : f32
    %89 = vector.broadcast %cst_46 : f32 to vector<16x128xf32>
    %90 = arith.maximumf %88, %89 : vector<16x128xf32>
    %c1 = arith.constant 1 : index
    %c0_47 = arith.constant 0 : index
    %91 = vector.load %arg11[%c1, %c0_47] : memref<3x128xf32, #tpu.memory_space<vmem>>, vector<1x128xf32>
    %92 = vector.broadcast %91 : vector<1x128xf32> to vector<16x128xf32>
    %93 = arith.mulf %90, %92 : vector<16x128xf32>
    %c2 = arith.constant 2 : index
    %c0_48 = arith.constant 0 : index
    %94 = vector.load %arg11[%c2, %c0_48] : memref<3x128xf32, #tpu.memory_space<vmem>>, vector<1x128xf32>
    %95 = vector.broadcast %94 : vector<1x128xf32> to vector<16x128xf32>
    %96 = arith.addf %93, %95 : vector<16x128xf32>
    %c2_i32 = arith.constant 2 : i32
    %97 = tpu.dynamic_rotate %96 by %c2_i32 dim 0 : vector<16x128xf32>, i32 -> vector<16x128xf32>
    %c-2_i32 = arith.constant -2 : i32
    %98 = vector.broadcast %c-2_i32 : i32 to vector<16x1xi32>
    %99 = arith.addi %51, %98 : vector<16x1xi32>
    %c0_i32_49 = arith.constant 0 : i32
    %100 = vector.broadcast %c0_i32_49 : i32 to vector<16x1xi32>
    %101 = arith.cmpi sge, %99, %100 : vector<16x1xi32>
    %c-2_i32_50 = arith.constant -2 : i32
    %102 = vector.broadcast %c-2_i32_50 : i32 to vector<16x1xi32>
    %103 = arith.addi %51, %102 : vector<16x1xi32>
    %c16_i32_51 = arith.constant 16 : i32
    %104 = vector.broadcast %c16_i32_51 : i32 to vector<16x1xi32>
    %105 = arith.cmpi slt, %103, %104 : vector<16x1xi32>
    %106 = arith.andi %101, %105 : vector<16x1xi1>
    %cst_52 = arith.constant 0.000000e+00 : f32
    %107 = vector.shape_cast %106 : vector<16x1xi1> to vector<16x1xi1>
    %108 = vector.broadcast %107 : vector<16x1xi1> to vector<16x128xi1>
    %109 = vector.broadcast %cst_52 : f32 to vector<16x128xf32>
    %110 = arith.select %108, %97, %109 : vector<16x128xi1>, vector<16x128xf32>
    %111 = arith.truncf %110 : vector<16x128xf32> to vector<16x128xbf16>
    %c1_i32_53 = arith.constant 1 : i32
    %112 = tpu.dynamic_rotate %96 by %c1_i32_53 dim 0 : vector<16x128xf32>, i32 -> vector<16x128xf32>
    %c-1_i32_54 = arith.constant -1 : i32
    %113 = vector.broadcast %c-1_i32_54 : i32 to vector<16x1xi32>
    %114 = arith.addi %51, %113 : vector<16x1xi32>
    %c0_i32_55 = arith.constant 0 : i32
    %115 = vector.broadcast %c0_i32_55 : i32 to vector<16x1xi32>
    %116 = arith.cmpi sge, %114, %115 : vector<16x1xi32>
    %c-1_i32_56 = arith.constant -1 : i32
    %117 = vector.broadcast %c-1_i32_56 : i32 to vector<16x1xi32>
    %118 = arith.addi %51, %117 : vector<16x1xi32>
    %c16_i32_57 = arith.constant 16 : i32
    %119 = vector.broadcast %c16_i32_57 : i32 to vector<16x1xi32>
    %120 = arith.cmpi slt, %118, %119 : vector<16x1xi32>
    %121 = arith.andi %116, %120 : vector<16x1xi1>
    %cst_58 = arith.constant 0.000000e+00 : f32
    %122 = vector.shape_cast %121 : vector<16x1xi1> to vector<16x1xi1>
    %123 = vector.broadcast %122 : vector<16x1xi1> to vector<16x128xi1>
    %124 = vector.broadcast %cst_58 : f32 to vector<16x128xf32>
    %125 = arith.select %123, %112, %124 : vector<16x128xi1>, vector<16x128xf32>
    %126 = arith.truncf %125 : vector<16x128xf32> to vector<16x128xbf16>
    %127 = arith.truncf %96 : vector<16x128xf32> to vector<16x128xbf16>
    %c15_i32_59 = arith.constant 15 : i32
    %128 = tpu.dynamic_rotate %96 by %c15_i32_59 dim 0 : vector<16x128xf32>, i32 -> vector<16x128xf32>
    %c1_i32_60 = arith.constant 1 : i32
    %129 = vector.broadcast %c1_i32_60 : i32 to vector<16x1xi32>
    %130 = arith.addi %51, %129 : vector<16x1xi32>
    %c0_i32_61 = arith.constant 0 : i32
    %131 = vector.broadcast %c0_i32_61 : i32 to vector<16x1xi32>
    %132 = arith.cmpi sge, %130, %131 : vector<16x1xi32>
    %c1_i32_62 = arith.constant 1 : i32
    %133 = vector.broadcast %c1_i32_62 : i32 to vector<16x1xi32>
    %134 = arith.addi %51, %133 : vector<16x1xi32>
    %c16_i32_63 = arith.constant 16 : i32
    %135 = vector.broadcast %c16_i32_63 : i32 to vector<16x1xi32>
    %136 = arith.cmpi slt, %134, %135 : vector<16x1xi32>
    %137 = arith.andi %132, %136 : vector<16x1xi1>
    %cst_64 = arith.constant 0.000000e+00 : f32
    %138 = vector.shape_cast %137 : vector<16x1xi1> to vector<16x1xi1>
    %139 = vector.broadcast %138 : vector<16x1xi1> to vector<16x128xi1>
    %140 = vector.broadcast %cst_64 : f32 to vector<16x128xf32>
    %141 = arith.select %139, %128, %140 : vector<16x128xi1>, vector<16x128xf32>
    %142 = arith.truncf %141 : vector<16x128xf32> to vector<16x128xbf16>
    %c14_i32 = arith.constant 14 : i32
    %143 = tpu.dynamic_rotate %96 by %c14_i32 dim 0 : vector<16x128xf32>, i32 -> vector<16x128xf32>
    %c2_i32_65 = arith.constant 2 : i32
    %144 = vector.broadcast %c2_i32_65 : i32 to vector<16x1xi32>
    %145 = arith.addi %51, %144 : vector<16x1xi32>
    %c0_i32_66 = arith.constant 0 : i32
    %146 = vector.broadcast %c0_i32_66 : i32 to vector<16x1xi32>
    %147 = arith.cmpi sge, %145, %146 : vector<16x1xi32>
    %c2_i32_67 = arith.constant 2 : i32
    %148 = vector.broadcast %c2_i32_67 : i32 to vector<16x1xi32>
    %149 = arith.addi %51, %148 : vector<16x1xi32>
    %c16_i32_68 = arith.constant 16 : i32
    %150 = vector.broadcast %c16_i32_68 : i32 to vector<16x1xi32>
    %151 = arith.cmpi slt, %149, %150 : vector<16x1xi32>
    %152 = arith.andi %147, %151 : vector<16x1xi1>
    %cst_69 = arith.constant 0.000000e+00 : f32
    %153 = vector.shape_cast %152 : vector<16x1xi1> to vector<16x1xi1>
    %154 = vector.broadcast %153 : vector<16x1xi1> to vector<16x128xi1>
    %155 = vector.broadcast %cst_69 : f32 to vector<16x128xf32>
    %156 = arith.select %154, %143, %155 : vector<16x128xi1>, vector<16x128xf32>
    %157 = arith.truncf %156 : vector<16x128xf32> to vector<16x128xbf16>
    %158 = tpu.concatenate %111, %126, %127, %142, %157 in 1 : vector<16x128xbf16>, vector<16x128xbf16>, vector<16x128xbf16>, vector<16x128xbf16>, vector<16x128xbf16> -> vector<16x640xbf16>
    %c0_70 = arith.constant 0 : index
    %c0_71 = arith.constant 0 : index
    %159 = vector.load %arg12[%c0_70, %c0_71] : memref<640x128xbf16, #tpu.memory_space<vmem>>, vector<640x128xbf16>
    %cst_72 = arith.constant dense<0.000000e+00> : vector<16x128xf32>
    %160 = tpu.matmul %158, %159, %cst_72 {dimension_numbers = #tpu.dot_dimension_numbers<[1], [0], [0], [1], [0, 0, 1, 1], [], []>} : vector<16x640xbf16>, vector<640x128xbf16>, vector<16x128xf32> -> vector<16x128xf32>
    %c0_73 = arith.constant 0 : index
    %c0_74 = arith.constant 0 : index
    %161 = vector.load %arg13[%c0_73, %c0_74] : memref<3x128xf32, #tpu.memory_space<vmem>>, vector<1x128xf32>
    %162 = vector.broadcast %161 : vector<1x128xf32> to vector<16x128xf32>
    %163 = arith.addf %160, %162 : vector<16x128xf32>
    %cst_75 = arith.constant 0.000000e+00 : f32
    %164 = vector.broadcast %cst_75 : f32 to vector<16x128xf32>
    %165 = arith.maximumf %163, %164 : vector<16x128xf32>
    %c1_76 = arith.constant 1 : index
    %c0_77 = arith.constant 0 : index
    %166 = vector.load %arg13[%c1_76, %c0_77] : memref<3x128xf32, #tpu.memory_space<vmem>>, vector<1x128xf32>
    %167 = vector.broadcast %166 : vector<1x128xf32> to vector<16x128xf32>
    %168 = arith.mulf %165, %167 : vector<16x128xf32>
    %c2_78 = arith.constant 2 : index
    %c0_79 = arith.constant 0 : index
    %169 = vector.load %arg13[%c2_78, %c0_79] : memref<3x128xf32, #tpu.memory_space<vmem>>, vector<1x128xf32>
    %170 = vector.broadcast %169 : vector<1x128xf32> to vector<16x128xf32>
    %171 = arith.addf %168, %170 : vector<16x128xf32>
    %172 = arith.truncf %171 : vector<16x128xf32> to vector<16x128xbf16>
    %c0_80 = arith.constant 0 : index
    %c0_81 = arith.constant 0 : index
    %173 = vector.load %arg14[%c0_80, %c0_81] : memref<128x128xbf16, #tpu.memory_space<vmem>>, vector<128x128xbf16>
    %cst_82 = arith.constant dense<0.000000e+00> : vector<16x128xf32>
    %174 = tpu.matmul %172, %173, %cst_82 {dimension_numbers = #tpu.dot_dimension_numbers<[1], [0], [0], [1], [0, 0, 1, 1], [], []>} : vector<16x128xbf16>, vector<128x128xbf16>, vector<16x128xf32> -> vector<16x128xf32>
    %175 = vector.shape_cast %174 : vector<16x128xf32> to vector<1x16x128xf32>
    %176 = arith.truncf %175 : vector<1x16x128xf32> to vector<1x16x128xbf16>
    %c0_83 = arith.constant 0 : index
    %c0_84 = arith.constant 0 : index
    %c0_85 = arith.constant 0 : index
    %177 = vector.load %arg24[%c0_83, %c0_84, %c0_85] : memref<1x128x128xbf16, #tpu.memory_space<vmem>>, vector<1x128x128xbf16>
    "tpu.trace_start"() <{level = 10 : i32, message = "bqh,bkh->bqk"}> : () -> ()
    %cst_86 = arith.constant dense<0.000000e+00> : vector<1x16x128xf32>
    %178 = tpu.matmul %176, %177, %cst_86 {dimension_numbers = #tpu.dot_dimension_numbers<[2], [2], [1], [1], [0, 0, 0, 1, 1, 1], [0], [0]>} : vector<1x16x128xbf16>, vector<1x128x128xbf16>, vector<1x16x128xf32> -> vector<1x16x128xf32>
    "tpu.trace_stop"() : () -> ()
    %cst_87 = arith.constant 0.176776692 : f32
    %179 = vector.broadcast %cst_87 : f32 to vector<1x16x128xf32>
    %180 = arith.mulf %178, %179 : vector<1x16x128xf32>
    %181 = tpu.iota {dimensions = array<i32: 2>} : vector<1x16x128xi32>
    %c8_i32 = arith.constant 8 : i32
    %182 = vector.broadcast %c8_i32 : i32 to vector<1x16x128xi32>
    %183 = arith.cmpi slt, %181, %182 : vector<1x16x128xi32>
    %cst_88 = arith.constant -1.000000e+30 : f32
    %184 = vector.broadcast %cst_88 : f32 to vector<1x16x128xf32>
    %185 = arith.select %183, %180, %184 : vector<1x16x128xi1>, vector<1x16x128xf32>
    %cst_89 = arith.constant dense<0xFF800000> : vector<1x16xf32>
    %186 = vector.multi_reduction <maximumf>, %185, %cst_89 [2] : vector<1x16x128xf32> to vector<1x16xf32>
    %187 = vector.shape_cast %186 : vector<1x16xf32> to vector<1x16x1xf32>
    %cst_90 = arith.constant dense<0xFF800000> : vector<1x1xf32>
    %188 = vector.multi_reduction <maximumf>, %187, %cst_90 [1] : vector<1x16x1xf32> to vector<1x1xf32>
    %189 = vector.shape_cast %188 : vector<1x1xf32> to vector<1x1x1xf32>
    %190 = vector.broadcast %189 : vector<1x1x1xf32> to vector<1x16x128xf32>
    %191 = arith.subf %185, %190 : vector<1x16x128xf32>
    %192 = math.exp %191 : vector<1x16x128xf32>
    %cst_91 = arith.constant dense<0.000000e+00> : vector<1x16xf32>
    %193 = vector.multi_reduction <add>, %192, %cst_91 [2] : vector<1x16x128xf32> to vector<1x16xf32>
    %194 = vector.shape_cast %193 : vector<1x16xf32> to vector<1x16x1xf32>
    %cst_92 = arith.constant dense<0.000000e+00> : vector<1x1xf32>
    %195 = vector.multi_reduction <add>, %194, %cst_92 [1] : vector<1x16x1xf32> to vector<1x1xf32>
    %196 = vector.shape_cast %195 : vector<1x1xf32> to vector<1x1x1xf32>
    %197 = vector.broadcast %196 : vector<1x1x1xf32> to vector<1x16x128xf32>
    %198 = arith.divf %192, %197 : vector<1x16x128xf32>
    %199 = arith.truncf %198 : vector<1x16x128xf32> to vector<1x16x128xbf16>
    "tpu.trace_start"() <{level = 10 : i32, message = "bqk,bkh->bqh"}> : () -> ()
    %cst_93 = arith.constant dense<0.000000e+00> : vector<1x16x128xf32>
    %200 = tpu.matmul %199, %177, %cst_93 {dimension_numbers = #tpu.dot_dimension_numbers<[2], [1], [1], [2], [0, 0, 0, 1, 1, 2], [0], [0]>} : vector<1x16x128xbf16>, vector<1x128x128xbf16>, vector<1x16x128xf32> -> vector<1x16x128xf32>
    "tpu.trace_stop"() : () -> ()
    %201 = arith.mulf %175, %200 : vector<1x16x128xf32>
    %cst_94 = arith.constant dense<0.000000e+00> : vector<1x128xf32>
    %202 = vector.multi_reduction <add>, %201, %cst_94 [1] : vector<1x16x128xf32> to vector<1x128xf32>
    %203 = arith.truncf %202 : vector<1x128xf32> to vector<1x128xbf16>
    %c0_95 = arith.constant 0 : index
    %c0_96 = arith.constant 0 : index
    %204 = vector.load %arg16[%c0_95, %c0_96] : memref<128x128xbf16, #tpu.memory_space<vmem>>, vector<128x128xbf16>
    %cst_97 = arith.constant dense<0.000000e+00> : vector<1x128xf32>
    %205 = tpu.matmul %203, %204, %cst_97 {dimension_numbers = #tpu.dot_dimension_numbers<[1], [0], [0], [1], [0, 0, 1, 1], [], []>} : vector<1x128xbf16>, vector<128x128xbf16>, vector<1x128xf32> -> vector<1x128xf32>
    %c0_98 = arith.constant 0 : index
    %c0_99 = arith.constant 0 : index
    %206 = vector.load %arg17[%c0_98, %c0_99] : memref<3x128xf32, #tpu.memory_space<vmem>>, vector<1x128xf32>
    %207 = arith.addf %205, %206 : vector<1x128xf32>
    %cst_100 = arith.constant 0.000000e+00 : f32
    %208 = vector.broadcast %cst_100 : f32 to vector<1x128xf32>
    %209 = arith.maximumf %207, %208 : vector<1x128xf32>
    %c1_101 = arith.constant 1 : index
    %c0_102 = arith.constant 0 : index
    %210 = vector.load %arg17[%c1_101, %c0_102] : memref<3x128xf32, #tpu.memory_space<vmem>>, vector<1x128xf32>
    %211 = arith.mulf %209, %210 : vector<1x128xf32>
    %c2_103 = arith.constant 2 : index
    %c0_104 = arith.constant 0 : index
    %212 = vector.load %arg17[%c2_103, %c0_104] : memref<3x128xf32, #tpu.memory_space<vmem>>, vector<1x128xf32>
    %213 = arith.addf %211, %212 : vector<1x128xf32>
    %214 = arith.truncf %213 : vector<1x128xf32> to vector<1x128xbf16>
    %c0_105 = arith.constant 0 : index
    %c0_106 = arith.constant 0 : index
    %215 = vector.load %arg18[%c0_105, %c0_106] : memref<128x128xbf16, #tpu.memory_space<vmem>>, vector<128x128xbf16>
    %cst_107 = arith.constant dense<0.000000e+00> : vector<1x128xf32>
    %216 = tpu.matmul %214, %215, %cst_107 {dimension_numbers = #tpu.dot_dimension_numbers<[1], [0], [0], [1], [0, 0, 1, 1], [], []>} : vector<1x128xbf16>, vector<128x128xbf16>, vector<1x128xf32> -> vector<1x128xf32>
    %c0_108 = arith.constant 0 : index
    %c0_109 = arith.constant 0 : index
    %217 = vector.load %arg19[%c0_108, %c0_109] : memref<3x128xf32, #tpu.memory_space<vmem>>, vector<1x128xf32>
    %218 = arith.addf %216, %217 : vector<1x128xf32>
    %cst_110 = arith.constant 0.000000e+00 : f32
    %219 = vector.broadcast %cst_110 : f32 to vector<1x128xf32>
    %220 = arith.maximumf %218, %219 : vector<1x128xf32>
    %c1_111 = arith.constant 1 : index
    %c0_112 = arith.constant 0 : index
    %221 = vector.load %arg19[%c1_111, %c0_112] : memref<3x128xf32, #tpu.memory_space<vmem>>, vector<1x128xf32>
    %222 = arith.mulf %220, %221 : vector<1x128xf32>
    %c2_113 = arith.constant 2 : index
    %c0_114 = arith.constant 0 : index
    %223 = vector.load %arg19[%c2_113, %c0_114] : memref<3x128xf32, #tpu.memory_space<vmem>>, vector<1x128xf32>
    %224 = arith.addf %222, %223 : vector<1x128xf32>
    %225 = arith.truncf %224 : vector<1x128xf32> to vector<1x128xbf16>
    %c0_115 = arith.constant 0 : index
    %c0_116 = arith.constant 0 : index
    %226 = vector.load %arg20[%c0_115, %c0_116] : memref<128x128xbf16, #tpu.memory_space<vmem>>, vector<128x128xbf16>
    %cst_117 = arith.constant dense<0.000000e+00> : vector<1x128xf32>
    %227 = tpu.matmul %225, %226, %cst_117 {dimension_numbers = #tpu.dot_dimension_numbers<[1], [0], [0], [1], [0, 0, 1, 1], [], []>} : vector<1x128xbf16>, vector<128x128xbf16>, vector<1x128xf32> -> vector<1x128xf32>
    %c0_118 = arith.constant 0 : index
    %c0_119 = arith.constant 0 : index
    %228 = vector.load %arg21[%c0_118, %c0_119] : memref<1x128xf32, #tpu.memory_space<vmem>>, vector<1x128xf32>
    %229 = arith.addf %227, %228 : vector<1x128xf32>
    %230 = vector.shape_cast %229 : vector<1x128xf32> to vector<1x1x128xf32>
    %c0_120 = arith.constant 0 : index
    %c0_121 = arith.constant 0 : index
    %c0_122 = arith.constant 0 : index
    %231 = vector.load %arg22[%c0_120, %c0_121, %c0_122] : memref<1x1x128xf32, #tpu.memory_space<vmem>>, vector<1x1x128xf32>
    tpu.vector_store %arg22[%c0_120, %c0_121, %c0_122], %230 {strides = array<i32>} : memref<1x1x128xf32, #tpu.memory_space<vmem>>, vector<1x1x128xf32>,
    %c0_123 = arith.constant 0 : index
    %c0_124 = arith.constant 0 : index
    %c0_125 = arith.constant 0 : index
    %232 = vector.load %arg23[%c0_123, %c0_124, %c0_125] : memref<1x16x128xf32, #tpu.memory_space<vmem>>, vector<1x16x128xf32>
    tpu.vector_store %arg23[%c0_123, %c0_124, %c0_125], %198 {strides = array<i32>} : memref<1x16x128xf32, #tpu.memory_space<vmem>>, vector<1x16x128xf32>,
    return
  }
  func.func @transform_0(%arg0: i32) -> (i32, i32, i32) {
    %c0_i32 = arith.constant 0 : i32
    %c0_i32_0 = arith.constant 0 : i32
    %c0_i32_1 = arith.constant 0 : i32
    return %arg0, %c0_i32, %c0_i32_0 : i32, i32, i32
  }
  func.func @transform_1(%arg0: i32) -> (i32, i32, i32) {
    %c0_i32 = arith.constant 0 : i32
    %c0_i32_0 = arith.constant 0 : i32
    %c0_i32_1 = arith.constant 0 : i32
    return %arg0, %c0_i32, %c0_i32_0 : i32, i32, i32
  }
  func.func @transform_2(%arg0: i32) -> (i32, i32, i32) {
    %c0_i32 = arith.constant 0 : i32
    %c0_i32_0 = arith.constant 0 : i32
    %c0_i32_1 = arith.constant 0 : i32
    return %arg0, %c0_i32, %c0_i32_0 : i32, i32, i32
  }
  func.func @transform_3(%arg0: i32) -> (i32, i32) {
    %c0_i32 = arith.constant 0 : i32
    %c0_i32_0 = arith.constant 0 : i32
    %c0_i32_1 = arith.constant 0 : i32
    return %c0_i32, %c0_i32_0 : i32, i32
  }
  func.func @transform_4(%arg0: i32) -> (i32, i32) {
    %c0_i32 = arith.constant 0 : i32
    %c0_i32_0 = arith.constant 0 : i32
    %c0_i32_1 = arith.constant 0 : i32
    return %c0_i32, %c0_i32_0 : i32, i32
  }
  func.func @transform_5(%arg0: i32) -> (i32, i32) {
    %c0_i32 = arith.constant 0 : i32
    %c0_i32_0 = arith.constant 0 : i32
    %c0_i32_1 = arith.constant 0 : i32
    return %c0_i32, %c0_i32_0 : i32, i32
  }
  func.func @transform_6(%arg0: i32) -> (i32, i32) {
    %c0_i32 = arith.constant 0 : i32
    %c0_i32_0 = arith.constant 0 : i32
    %c0_i32_1 = arith.constant 0 : i32
    return %c0_i32, %c0_i32_0 : i32, i32
  }
  func.func @transform_7(%arg0: i32) -> (i32, i32) {
    %c0_i32 = arith.constant 0 : i32
    %c0_i32_0 = arith.constant 0 : i32
    %c0_i32_1 = arith.constant 0 : i32
    return %c0_i32, %c0_i32_0 : i32, i32
  }
  func.func @transform_8(%arg0: i32) -> (i32, i32) {
    %c0_i32 = arith.constant 0 : i32
    %c0_i32_0 = arith.constant 0 : i32
    %c0_i32_1 = arith.constant 0 : i32
    return %c0_i32, %c0_i32_0 : i32, i32
  }
  func.func @transform_9(%arg0: i32) -> (i32, i32) {
    %c0_i32 = arith.constant 0 : i32
    %c0_i32_0 = arith.constant 0 : i32
    %c0_i32_1 = arith.constant 0 : i32
    return %c0_i32, %c0_i32_0 : i32, i32
  }
  func.func @transform_10(%arg0: i32) -> (i32, i32) {
    %c0_i32 = arith.constant 0 : i32
    %c0_i32_0 = arith.constant 0 : i32
    %c0_i32_1 = arith.constant 0 : i32
    return %c0_i32, %c0_i32_0 : i32, i32
  }
  func.func @transform_11(%arg0: i32) -> (i32, i32) {
    %c0_i32 = arith.constant 0 : i32
    %c0_i32_0 = arith.constant 0 : i32
    %c0_i32_1 = arith.constant 0 : i32
    return %c0_i32, %c0_i32_0 : i32, i32
  }
  func.func @transform_12(%arg0: i32) -> (i32, i32) {
    %c0_i32 = arith.constant 0 : i32
    %c0_i32_0 = arith.constant 0 : i32
    %c0_i32_1 = arith.constant 0 : i32
    return %c0_i32, %c0_i32_0 : i32, i32
  }
  func.func @transform_13(%arg0: i32) -> (i32, i32) {
    %c0_i32 = arith.constant 0 : i32
    %c0_i32_0 = arith.constant 0 : i32
    %c0_i32_1 = arith.constant 0 : i32
    return %c0_i32, %c0_i32_0 : i32, i32
  }
  func.func @transform_14(%arg0: i32) -> (i32, i32) {
    %c0_i32 = arith.constant 0 : i32
    %c0_i32_0 = arith.constant 0 : i32
    %c0_i32_1 = arith.constant 0 : i32
    return %c0_i32, %c0_i32_0 : i32, i32
  }
  func.func @transform_15(%arg0: i32) -> (i32, i32) {
    %c0_i32 = arith.constant 0 : i32
    %c0_i32_0 = arith.constant 0 : i32
    %c0_i32_1 = arith.constant 0 : i32
    return %c0_i32, %c0_i32_0 : i32, i32
  }
  func.func @transform_16(%arg0: i32) -> (i32, i32) {
    %c0_i32 = arith.constant 0 : i32
    %c0_i32_0 = arith.constant 0 : i32
    %c0_i32_1 = arith.constant 0 : i32
    return %c0_i32, %c0_i32_0 : i32, i32
  }
  func.func @transform_17(%arg0: i32) -> (i32, i32) {
    %c0_i32 = arith.constant 0 : i32
    %c0_i32_0 = arith.constant 0 : i32
    %c0_i32_1 = arith.constant 0 : i32
    return %c0_i32, %c0_i32_0 : i32, i32
  }
  func.func @transform_18(%arg0: i32) -> (i32, i32) {
    %c0_i32 = arith.constant 0 : i32
    %c0_i32_0 = arith.constant 0 : i32
    %c0_i32_1 = arith.constant 0 : i32
    return %c0_i32, %c0_i32_0 : i32, i32
  }
  func.func @transform_19(%arg0: i32) -> (i32, i32) {
    %c0_i32 = arith.constant 0 : i32
    %c0_i32_0 = arith.constant 0 : i32
    %c0_i32_1 = arith.constant 0 : i32
    return %c0_i32, %c0_i32_0 : i32, i32
  }
  func.func @transform_20(%arg0: i32) -> (i32, i32) {
    %c0_i32 = arith.constant 0 : i32
    %c0_i32_0 = arith.constant 0 : i32
    %c0_i32_1 = arith.constant 0 : i32
    return %c0_i32, %c0_i32_0 : i32, i32
  }
  func.func @transform_21(%arg0: i32) -> (i32, i32, i32) {
    %c0_i32 = arith.constant 0 : i32
    %c0_i32_0 = arith.constant 0 : i32
    %c0_i32_1 = arith.constant 0 : i32
    return %arg0, %c0_i32, %c0_i32_0 : i32, i32, i32
  }
  func.func @transform_22(%arg0: i32) -> (i32, i32, i32) {
    %c0_i32 = arith.constant 0 : i32
    %c0_i32_0 = arith.constant 0 : i32
    %c0_i32_1 = arith.constant 0 : i32
    return %arg0, %c0_i32, %c0_i32_0 : i32, i32, i32
  }
}

</mosaic_0001>

<bundles_post_ra>
// kernel: drugban_forward.1
= control target key start
LH: loop header
LB: loop body
LE: loop exit
PB: predicated region body
PF: predicated region fallthrough
CT: control target
= control target key end

     0   :  { %s5495_s0 = inlined_call_operand.vmem [shape: f32[2,8,8], index: 0, kind: input, shape index: {}]   ;;  %s5496_s1 = inlined_call_operand.vmem [shape: f32[2,8,128], index: 1, kind: input, shape index: {}]   ;;  %s5497_s2 = inlined_call_operand.vmem [shape: s32[2,1,16], index: 2, kind: input, shape index: {}]   ;;  %s5498_s3 = inlined_call_operand.vmem [shape: bf16[128,128], index: 3, kind: input, shape index: {}]   ;;  %s5499_s4 = inlined_call_operand.hbm [shape: bf16[128,128], index: 4, kind: input, shape index: {}]   ;;  %s5500_s5 = inlined_call_operand.vmem [shape: f32[1,128], index: 5, kind: input, shape index: {}]   ;;  %s5501_s6 = inlined_call_operand.hbm [shape: bf16[128,128], index: 6, kind: input, shape index: {}]   ;;  %s5502_s7 = inlined_call_operand.hbm [shape: f32[1,128], index: 7, kind: input, shape index: {}]   ;;  %s5503_s8 = inlined_call_operand.hbm [shape: bf16[32,128], index: 8, kind: input, shape index: {}]   ;;  %s5504_s9 = inlined_call_operand.hbm [shape: bf16[384,128], index: 9, kind: input, shape index: {}]   ;;  %s5505_s10 = inlined_call_operand.hbm [shape: f32[3,128], index: 10, kind: input, shape index: {}]   ;;  %s5506_s11 = inlined_call_operand.hbm [shape: bf16[640,128], index: 11, kind: input, shape index: {}]   ;;  %s5507_s12 = inlined_call_operand.hbm [shape: f32[3,128], index: 12, kind: input, shape index: {}]   ;;  %s5508_s13 = inlined_call_operand.hbm [shape: bf16[128,128], index: 13, kind: input, shape index: {}]   ;;  %s5509_s14 = inlined_call_operand.hbm [shape: bf16[128,128], index: 14, kind: input, shape index: {}]   ;;  %s5510_s15 = inlined_call_operand.hbm [shape: bf16[128,128], index: 15, kind: input, shape index: {}]   ;;  %s5511_s16 = inlined_call_operand.hbm [shape: f32[3,128], index: 16, kind: input, shape index: {}]   ;;  %s5512_s17 = inlined_call_operand.hbm [shape: bf16[128,128], index: 17, kind: input, shape index: {}]   ;;  %s5513_s18 = inlined_call_operand.hbm [shape: f32[3,128], index: 18, kind: input, shape index: {}]   ;;  %s5514_s19 = inlined_call_operand.hbm [shape: bf16[128,128], index: 19, kind: input, shape index: {}]   ;;  %s5515_s20 = inlined_call_operand.hbm [shape: f32[1,128], index: 20, kind: input, shape index: {}]   ;;  %s5516_s21 = inlined_call_operand.vmem [shape: f32[2,1,128], index: 21, kind: output, shape index: {0}]   ;;  %s5517_s22 = inlined_call_operand.vmem [shape: f32[2,16,128], index: 22, kind: output, shape index: {1}]  }
   0x1   :  { %5528 = sst [smem:[#allocation40_spill]] %s5495_s0 }
   0x2   :  { %5529 = sst [smem:[#allocation41_spill]] %s5496_s1 }
   0x3   :  { %5530 = sst [smem:[#allocation42_spill]] %s5497_s2 }
   0x4   :  { %5531 = sst [smem:[#allocation43_spill]] %s5498_s3 }
   0x5   :  { %5532 = sst [smem:[#allocation44_spill]] %s5499_s4 }
   0x6   :  { %5533 = sst [smem:[#allocation45_spill]] %s5500_s5 }
   0x7   :  { %5534 = sst [smem:[#allocation46_spill]] %s5501_s6 }
   0x8   :  { %5535 = sst [smem:[#allocation47_spill]] %s5503_s8 }
   0x9   :  { %5536 = sst [smem:[#allocation48_spill]] %s5515_s20 }
   0xa   :  { %5537 = sst [smem:[#allocation49_spill]] %s5516_s21 }
   0xb   :  { %5538 = sst [smem:[#allocation50_spill]] %s5517_s22 }
   0xc   :  { %28 = vsyncpa [#allocation4], 0 }
   0xd   :  { %29 = vsyncpa [#allocation6], 0 }
   0xe   :  { %30 = vsyncpa [#allocation9], 0 }
   0xf   :  { %31 = vsyncpa [#allocation12], 0 }
  0x10   :  { %32 = vsyncpa [#allocation15], 0 }
  0x11   :  { %33 = vsyncpa [#allocation18], 0 }
  0x12   :  { %34 = vsyncpa [#allocation21], 0 }
  0x13   :  { %35 = vsyncpa [#allocation24], 0 }
  0x14   :  { %36 = vsyncpa [#allocation27], 0  ;;  %s4833_s3 = smov 0  }
  0x15 LB: > { %5539 = sst [smem:[#allocation37_spill]] %s4695_s3  ;;  %s4839_s28 = sadd.s32 4294967295, %s4695_s3   ;;  %s4695_s3 = sphi %s4833_s3, %s42_s3  }
  0x16   : > { %5540 = sst [smem:[#allocation38_spill]] %s4839_s28  ;;  %p3290_p0 = scmp.ge.s32.totalorder %s4695_s3, 1 }
  0x17   : > { %p555_p1 = scmp.lt.s32.totalorder %s4695_s3, 3  ;;  %p5526_p2 = scmp.eq.s32.totalorder %s4839_s28, 0 }
  0x18   : > { %s4697_s30 = smov [#allocation5]   ;;  %s4698_s0 = smov [#allocation8]  }
  0x19   : > { %p4844_p3 = pnand %p3290_p0, %p555_p1  ;;  %s586_s4 = sshll.u32 %s4697_s30, 4  ;;  %s4848_s4 = int_to_ptr.vmem [resolvable:$true] %s586_s4 }
  0x1a   : > { %s610_s23 = sshll.u32 %s4698_s0, 4  ;;  %s4699_s5 = smov [#allocation11]   ;;  %s4852_s23 = int_to_ptr.vmem [resolvable:$true] %s610_s23 }
  0x1b   : > { %s5541_s29 = scalar_select %p4844_p3, 1, 0 }
  0x1c   : > { %p3959_p4 = pneg %p4844_p3  ;;  %s637_s24 = sshll.u32 %s4699_s5, 4  ;;  %s4860_s24 = int_to_ptr.vmem [resolvable:$true] %s637_s24 }
  0x1d   : > { %5542 = sst [smem:[#allocation39_spill]] %s5541_s29  ;;  %s4700_s6 = smov [#allocation14]  }
  0x1e   : > { %p4856_p5 = pnand %p5526_p2, %p3959_p4  ;;  %s4862_s25 = sshll.u32 %s4700_s6, 4  ;;  %s662_s25 = int_to_ptr.vmem [resolvable:$true] %s4862_s25 }
  0x1f   : > { %s5544_s27 = sld [smem:[#allocation46_spill]] }
  0x20   : > { %p4872_p7 = pneg %p4856_p5 }
  0x25   : > { %s4205_s30 = scalar_lea.hbm %s5544_s27, 1024 }
  0x26   : > { %p4206_p6 = scmp.ne.s32.totalorder %s5544_s27, %s4205_s30  ;;  %p4212_p10 = scmp.lt.u32.totalorder %s4205_s30, %s5544_s27 }
  0x28   : > { %p4208_p8 = pnand %p4872_p7, %p4206_p6 }
  0x2a   : > { %p4209_p9 = pneg %p4208_p8 }
  0x2c   : > { %p4214_p11 = pnand %p4212_p10, %p4209_p9 }
  0x2e   : > { %4217 = shalt.err (!%p4214_p11)
}
  0x2f   : > { %s4218_s3 = scalar_lea.vmem %s4848_s4, 1024  ;;  %p4226_p1 = scmp.lt.s32.totalorder %s4848_s4, %s4848_s4 }
  0x30   : > { %p4219_p12 = scmp.ne.s32.totalorder %s4848_s4, %s4218_s3  ;;  %p4227_p4 = scmp.lt.s32.totalorder %s4218_s3, %s4218_s3 }
  0x32   : > { %p4221_p13 = pnand %p4219_p12, %p4872_p7  ;;  %p4228_p6 = por %p4227_p4, %p4226_p1 }
  0x34   : > { %p4222_p0 = pneg %p4221_p13 }
  0x36   : > { %p4229_p8 = pnand %p4228_p6, %p4222_p0 }
  0x38   : > { %4232 = shalt.err (!%p4229_p8)
}
  0x39   : > { %s4701_s26 = smov 64   ;;  %s4702_s2 = smov 4  }
  0x3a   : > { %3965 = dma.hbm_to_vmem [thread:$0]  (!%p4856_p5), %s5544_s27, 1024, %s4848_s4, [#allocation6], %s4701_s26, %s4701_s26, %s4702_s2  }
  0x3b   : > { %s5546_s8 = sld [smem:[#allocation47_spill]] }
  0x41   : > { %s4233_s3 = scalar_lea.hbm %s5546_s8, 256 }
  0x42   : > { %p4234_p9 = scmp.ne.s32.totalorder %s5546_s8, %s4233_s3  ;;  %p4240_p12 = scmp.lt.u32.totalorder %s4233_s3, %s5546_s8 }
  0x44   : > { %p4236_p10 = pnand %p4234_p9, %p4872_p7 }
  0x46   : > { %p4237_p11 = pneg %p4236_p10 }
  0x48   : > { %p4242_p13 = pnand %p4240_p12, %p4237_p11 }
  0x4a   : > { %4245 = shalt.err (!%p4242_p13)
}
  0x4b   : > { %s4246_s4 = scalar_lea.vmem %s4852_s23, 256  ;;  %p4254_p6 = scmp.lt.s32.totalorder %s4852_s23, %s4852_s23 }
  0x4c   : > { %p4247_p0 = scmp.ne.s32.totalorder %s4852_s23, %s4246_s4  ;;  %p4255_p8 = scmp.lt.s32.totalorder %s4246_s4, %s4246_s4 }
  0x4e   : > { %p4249_p1 = pnand %p4247_p0, %p4872_p7  ;;  %p4256_p9 = por %p4255_p8, %p4254_p6 }
  0x50   : > { %p4250_p4 = pneg %p4249_p1 }
  0x52   : > { %p4257_p10 = pnand %p4256_p9, %p4250_p4 }
  0x54   : > { %4260 = shalt.err (!%p4257_p10)
}
  0x55   : > { %3971 = dma.hbm_to_vmem [thread:$0]  (!%p4856_p5), %s5546_s8, 256, %s4852_s23, [#allocation9], %s4701_s26, %s4701_s26, %s4702_s2  }
  0x56   : > { %s4261_s30 = scalar_lea.hbm %s5505_s10, 64 }
  0x57   : > { %p4262_p11 = scmp.ne.s32.totalorder %s5505_s10, %s4261_s30  ;;  %p4268_p0 = scmp.lt.u32.totalorder %s4261_s30, %s5505_s10 }
  0x59   : > { %p4264_p12 = pnand %p4262_p11, %p4872_p7 }
  0x5b   : > { %p4265_p13 = pneg %p4264_p12 }
  0x5d   : > { %p4270_p1 = pnand %p4268_p0, %p4265_p13 }
  0x5f   : > { %4273 = shalt.err (!%p4270_p1)
}
  0x60   : > { %s4274_s23 = scalar_lea.vmem %s4860_s24, 64  ;;  %p4282_p9 = scmp.lt.s32.totalorder %s4860_s24, %s4860_s24 }
  0x61   : > { %p4275_p4 = scmp.ne.s32.totalorder %s4860_s24, %s4274_s23  ;;  %p4283_p10 = scmp.lt.s32.totalorder %s4274_s23, %s4274_s23 }
  0x63   : > { %p4277_p6 = pnand %p4275_p4, %p4872_p7  ;;  %p4284_p11 = por %p4283_p10, %p4282_p9 }
  0x65   : > { %p4278_p8 = pneg %p4277_p6 }
  0x67   : > { %p4285_p12 = pnand %p4284_p11, %p4278_p8 }
  0x69   : > { %4288 = shalt.err (!%p4285_p12)
}
  0x6a   : > { %3977 = dma.hbm_to_vmem [thread:$0]  (!%p4856_p5), %s5505_s10, 64, %s4860_s24, [#allocation12]  }
  0x6b   : > { %s4289_s29 = scalar_lea.hbm %s5507_s12, 64 }
  0x6c   : > { %p4290_p13 = scmp.ne.s32.totalorder %s5507_s12, %s4289_s29  ;;  %p4296_p4 = scmp.lt.u32.totalorder %s4289_s29, %s5507_s12 }
  0x6e   : > { %p4292_p0 = pnand %p4290_p13, %p4872_p7 }
  0x70   : > { %p4293_p1 = pneg %p4292_p0 }
  0x72   : > { %p4298_p6 = pnand %p4296_p4, %p4293_p1 }
  0x74   : > { %4301 = shalt.err (!%p4298_p6)
}
  0x75   : > { %s4302_s3 = scalar_lea.vmem %s662_s25, 64  ;;  %p4310_p11 = scmp.lt.s32.totalorder %s662_s25, %s662_s25 }
  0x76   : > { %p4303_p8 = scmp.ne.s32.totalorder %s662_s25, %s4302_s3  ;;  %p4311_p12 = scmp.lt.s32.totalorder %s4302_s3, %s4302_s3 }
  0x78   : > { %p4305_p9 = pnand %p4303_p8, %p4872_p7  ;;  %p4312_p2 = por %p4311_p12, %p4310_p11 }
  0x7a   : > { %p4306_p10 = pneg %p4305_p9 }
  0x7c   : > { %p4313_p3 = pnand %p4312_p2, %p4306_p10 }
  0x7e   : > { %4316 = shalt.err (!%p4313_p3)
}
  0x7f   : > { %3983 = dma.hbm_to_vmem [thread:$0]  (!%p4856_p5), %s5507_s12, 64, %s662_s25, [#allocation15]  }
  0x80   : > { %s4703_s4 = smov [#allocation17]   ;;  %s4704_s22 = smov [#allocation20]  }
  0x81   : > { %s684_s20 = sshll.u32 %s4703_s4, 4  ;;  %s711_s28 = sshll.u32 %s4704_s22, 4  ;;  %s685_s20 = int_to_ptr.vmem [resolvable:$true] %s684_s20  ;;  %s712_s28 = int_to_ptr.vmem [resolvable:$true] %s711_s28 }
  0x82   : > { %s4317_s0 = scalar_lea.hbm %s5509_s14, 1024 }
  0x83   : > { %p4318_p2 = scmp.ne.s32.totalorder %s5509_s14, %s4317_s0  ;;  %p4324_p0 = scmp.lt.u32.totalorder %s4317_s0, %s5509_s14 }
  0x85   : > { %p4320_p3 = pnand %p4318_p2, %p4872_p7 }
  0x87   : > { %p4321_p13 = pneg %p4320_p3 }
  0x89   : > { %p4326_p1 = pnand %p4324_p0, %p4321_p13 }
  0x8b   : > { %4329 = shalt.err (!%p4326_p1)
}
  0x8c   : > { %s4330_s25 = scalar_lea.vmem %s685_s20, 1024  ;;  %p4338_p9 = scmp.lt.s32.totalorder %s685_s20, %s685_s20 }
  0x8d   : > { %p4331_p4 = scmp.ne.s32.totalorder %s685_s20, %s4330_s25  ;;  %p4339_p10 = scmp.lt.s32.totalorder %s4330_s25, %s4330_s25 }
  0x8f   : > { %p4333_p6 = pnand %p4331_p4, %p4872_p7  ;;  %p4340_p11 = por %p4339_p10, %p4338_p9 }
  0x91   : > { %p4334_p8 = pneg %p4333_p6 }
  0x93   : > { %p4341_p12 = pnand %p4340_p11, %p4334_p8 }
  0x95   : > { %4344 = shalt.err (!%p4341_p12)
}
  0x96   : > { %3989 = dma.hbm_to_vmem [thread:$0]  (!%p4856_p5), %s5509_s14, 1024, %s685_s20, [#allocation18], %s4701_s26, %s4701_s26, %s4702_s2  }
  0x97   : > { %s4345_s30 = scalar_lea.hbm %s5511_s16, 64 }
  0x98   : > { %p4346_p2 = scmp.ne.s32.totalorder %s5511_s16, %s4345_s30  ;;  %p4352_p0 = scmp.lt.u32.totalorder %s4345_s30, %s5511_s16 }
  0x9a   : > { %p4348_p3 = pnand %p4346_p2, %p4872_p7 }
  0x9c   : > { %p4349_p13 = pneg %p4348_p3 }
  0x9e   : > { %p4354_p1 = pnand %p4352_p0, %p4349_p13 }
  0xa0   : > { %4357 = shalt.err (!%p4354_p1)
}
  0xa1   : > { %s4358_s24 = scalar_lea.vmem %s712_s28, 64  ;;  %p4366_p9 = scmp.lt.s32.totalorder %s712_s28, %s712_s28 }
  0xa2   : > { %p4359_p4 = scmp.ne.s32.totalorder %s712_s28, %s4358_s24  ;;  %p4367_p10 = scmp.lt.s32.totalorder %s4358_s24, %s4358_s24 }
  0xa4   : > { %p4361_p6 = pnand %p4359_p4, %p4872_p7  ;;  %p4368_p11 = por %p4367_p10, %p4366_p9 }
  0xa6   : > { %p4362_p8 = pneg %p4361_p6 }
  0xa8   : > { %p4369_p12 = pnand %p4368_p11, %p4362_p8 }
  0xaa   : > { %4372 = shalt.err (!%p4369_p12)
}
  0xab   : > { %3995 = dma.hbm_to_vmem [thread:$0]  (!%p4856_p5), %s5511_s16, 64, %s712_s28, [#allocation21]  }
  0xac   : > { %s4705_s23 = smov [#allocation23]   ;;  %s4706_s22 = smov [#allocation3]  }
  0xad   : > { %s735_s4 = sshll.u32 %s4705_s23, 4  ;;  %s570_s29 = sshll.u32 %s4706_s22, 4  ;;  %s736_s4 = int_to_ptr.vmem [resolvable:$true] %s735_s4  ;;  %s571_s29 = int_to_ptr.vmem [resolvable:$true] %s570_s29 }
  0xae   : > { %s4373_s5 = scalar_lea.hbm %s5513_s18, 64 }
  0xaf   : > { %p4374_p2 = scmp.ne.s32.totalorder %s5513_s18, %s4373_s5  ;;  %p4380_p0 = scmp.lt.u32.totalorder %s4373_s5, %s5513_s18 }
  0xb1   : > { %p4376_p3 = pnand %p4374_p2, %p4872_p7 }
  0xb3   : > { %p4377_p13 = pneg %p4376_p3 }
  0xb5   : > { %p4382_p1 = pnand %p4380_p0, %p4377_p13 }
  0xb7   : > { %4385 = shalt.err (!%p4382_p1)
}
  0xb8   : > { %s4386_s28 = scalar_lea.vmem %s736_s4, 64  ;;  %p4394_p9 = scmp.lt.s32.totalorder %s736_s4, %s736_s4 }
  0xb9   : > { %p4387_p4 = scmp.ne.s32.totalorder %s736_s4, %s4386_s28  ;;  %p4395_p10 = scmp.lt.s32.totalorder %s4386_s28, %s4386_s28 }
  0xbb   : > { %p4389_p6 = pnand %p4387_p4, %p4872_p7  ;;  %p4396_p11 = por %p4395_p10, %p4394_p9 }
  0xbd   : > { %p4390_p8 = pneg %p4389_p6 }
  0xbf   : > { %p4397_p12 = pnand %p4396_p11, %p4390_p8 }
  0xc1   : > { %4400 = shalt.err (!%p4397_p12)
}
  0xc2   : > { %4001 = dma.hbm_to_vmem [thread:$0]  (!%p4856_p5), %s5513_s18, 64, %s736_s4, [#allocation24]  }
  0xc3   : > { %s5547_s0 = sld [smem:[#allocation44_spill]] }
  0xc9   : > { %s4401_s5 = scalar_lea.hbm %s5547_s0, 1024 }
  0xca   : > { %p4402_p2 = scmp.ne.s32.totalorder %s5547_s0, %s4401_s5  ;;  %p4408_p0 = scmp.lt.u32.totalorder %s4401_s5, %s5547_s0 }
  0xcc   : > { %p4404_p3 = pnand %p4402_p2, %p4872_p7 }
  0xce   : > { %p4405_p13 = pneg %p4404_p3 }
  0xd0   : > { %p4410_p1 = pnand %p4408_p0, %p4405_p13 }
  0xd2   : > { %4413 = shalt.err (!%p4410_p1)
}
  0xd3   : > { %s4414_s28 = scalar_lea.vmem %s571_s29, 1024  ;;  %p4422_p9 = scmp.lt.s32.totalorder %s571_s29, %s571_s29 }
  0xd4   : > { %p4415_p4 = scmp.ne.s32.totalorder %s571_s29, %s4414_s28  ;;  %p4423_p10 = scmp.lt.s32.totalorder %s4414_s28, %s4414_s28 }
  0xd6   : > { %p4417_p6 = pnand %p4415_p4, %p4872_p7  ;;  %p4424_p11 = por %p4423_p10, %p4422_p9 }
  0xd8   : > { %p4418_p8 = pneg %p4417_p6 }
  0xda   : > { %p4425_p12 = pnand %p4424_p11, %p4418_p8 }
  0xdc   : > { %4428 = shalt.err (!%p4425_p12)
}
  0xdd   : > { %3962 = dma.hbm_to_vmem [thread:$0]  (!%p4856_p5), %s5547_s0, 1024, %s571_s29, [#allocation4], %s4701_s26, %s4701_s26, %s4702_s2  }
  0xde   : > { %s4707_s23 = smov [#allocation7]   ;;  %s4708_s30 = smov [#allocation10]  }
  0xdf   : > { %s600_s22 = sshll.u32 %s4707_s23, 4  ;;  %s623_s5 = sshll.u32 %s4708_s30, 4  ;;  %s601_s22 = int_to_ptr.vmem [resolvable:$true] %s600_s22  ;;  %s624_s5 = int_to_ptr.vmem [resolvable:$true] %s623_s5 }
  0xe0   : > { %s4429_s24 = scalar_lea.hbm %s5502_s7, 16 }
  0xe1   : > { %p4430_p2 = scmp.ne.s32.totalorder %s5502_s7, %s4429_s24  ;;  %p4436_p0 = scmp.lt.u32.totalorder %s4429_s24, %s5502_s7 }
  0xe3   : > { %p4432_p3 = pnand %p4430_p2, %p4872_p7 }
  0xe5   : > { %p4433_p13 = pneg %p4432_p3 }
  0xe7   : > { %p4438_p1 = pnand %p4436_p0, %p4433_p13 }
  0xe9   : > { %4441 = shalt.err (!%p4438_p1)
}
  0xea   : > { %s4442_s29 = scalar_lea.vmem %s601_s22, 16  ;;  %s4449_s25 = scalar_lea.vmem %s601_s22, 32 }
  0xeb   : > { %p4443_p4 = scmp.ne.s32.totalorder %s601_s22, %s4442_s29  ;;  %p4450_p9 = scmp.lt.s32.totalorder %s601_s22, %s601_s22 }
  0xec   : > { %p4451_p10 = scmp.lt.s32.totalorder %s4449_s25, %s4442_s29 }
  0xed   : > { %p4445_p6 = pnand %p4443_p4, %p4872_p7 }
  0xee   : > { %p4452_p11 = por %p4451_p10, %p4450_p9 }
  0xef   : > { %p4446_p8 = pneg %p4445_p6 }
  0xf1   : > { %p4453_p12 = pnand %p4452_p11, %p4446_p8 }
  0xf3   : > { %4456 = shalt.err (!%p4453_p12)
}
  0xf4   : > { %3968 = dma.hbm_to_vmem [thread:$0]  (!%p4856_p5), %s5502_s7, 16, %s601_s22, [#allocation6]  }
  0xf5   : > { %s4457_s3 = scalar_lea.hbm %s5504_s9, 3072 }
  0xf6   : > { %p4458_p2 = scmp.ne.s32.totalorder %s5504_s9, %s4457_s3  ;;  %p4464_p0 = scmp.lt.u32.totalorder %s4457_s3, %s5504_s9 }
  0xf8   : > { %p4460_p3 = pnand %p4458_p2, %p4872_p7 }
  0xfa   : > { %p4461_p13 = pneg %p4460_p3 }
  0xfc   : > { %p4466_p1 = pnand %p4464_p0, %p4461_p13 }
  0xfe   : > { %4469 = shalt.err (!%p4466_p1)
}
  0xff   : > { %s4470_s29 = scalar_lea.vmem %s624_s5, 3072  ;;  %p4478_p9 = scmp.lt.s32.totalorder %s624_s5, %s624_s5 }
 0x100   : > { %p4471_p4 = scmp.ne.s32.totalorder %s624_s5, %s4470_s29  ;;  %p4479_p10 = scmp.lt.s32.totalorder %s4470_s29, %s4470_s29 }
 0x102   : > { %p4473_p6 = pnand %p4471_p4, %p4872_p7  ;;  %p4480_p11 = por %p4479_p10, %p4478_p9 }
 0x104   : > { %p4474_p8 = pneg %p4473_p6 }
 0x106   : > { %p4481_p12 = pnand %p4480_p11, %p4474_p8 }
 0x108   : > { %4484 = shalt.err (!%p4481_p12)
}
 0x109   : > { %3974 = dma.hbm_to_vmem [thread:$0]  (!%p4856_p5), %s5504_s9, 3072, %s624_s5, [#allocation9], %s4701_s26, %s4701_s26, %s4702_s2  }
 0x10a   : > { %s4709_s23 = smov [#allocation13]   ;;  %s4710_s8 = smov [#allocation16]  }
 0x10b   : > { %s647_s30 = sshll.u32 %s4709_s23, 4  ;;  %s671_s6 = sshll.u32 %s4710_s8, 4  ;;  %s648_s30 = int_to_ptr.vmem [resolvable:$true] %s647_s30  ;;  %s672_s6 = int_to_ptr.vmem [resolvable:$true] %s671_s6 }
 0x10c   : > { %s4485_s20 = scalar_lea.hbm %s5506_s11, 5120 }
 0x10d   : > { %p4486_p2 = scmp.ne.s32.totalorder %s5506_s11, %s4485_s20  ;;  %p4492_p0 = scmp.lt.u32.totalorder %s4485_s20, %s5506_s11 }
 0x10f   : > { %p4488_p3 = pnand %p4486_p2, %p4872_p7 }
 0x111   : > { %p4489_p13 = pneg %p4488_p3 }
 0x113   : > { %p4494_p1 = pnand %p4492_p0, %p4489_p13 }
 0x115   : > { %4497 = shalt.err (!%p4494_p1)
}
 0x116   : > { %s4498_s5 = scalar_lea.vmem %s648_s30, 5120  ;;  %p4506_p9 = scmp.lt.s32.totalorder %s648_s30, %s648_s30 }
 0x117   : > { %p4499_p4 = scmp.ne.s32.totalorder %s648_s30, %s4498_s5  ;;  %p4507_p10 = scmp.lt.s32.totalorder %s4498_s5, %s4498_s5 }
 0x119   : > { %p4501_p6 = pnand %p4499_p4, %p4872_p7  ;;  %p4508_p11 = por %p4507_p10, %p4506_p9 }
 0x11b   : > { %p4502_p8 = pneg %p4501_p6 }
 0x11d   : > { %p4509_p12 = pnand %p4508_p11, %p4502_p8 }
 0x11f   : > { %4512 = shalt.err (!%p4509_p12)
}
 0x120   : > { %3980 = dma.hbm_to_vmem [thread:$0]  (!%p4856_p5), %s5506_s11, 5120, %s648_s30, [#allocation12], %s4701_s26, %s4701_s26, %s4702_s2  }
 0x121   : > { %s4513_s24 = scalar_lea.hbm %s5508_s13, 1024 }
 0x122   : > { %p4514_p2 = scmp.ne.s32.totalorder %s5508_s13, %s4513_s24  ;;  %p4520_p0 = scmp.lt.u32.totalorder %s4513_s24, %s5508_s13 }
 0x124   : > { %p4516_p3 = pnand %p4514_p2, %p4872_p7 }
 0x126   : > { %p4517_p13 = pneg %p4516_p3 }
 0x128   : > { %p4522_p1 = pnand %p4520_p0, %p4517_p13 }
 0x12a   : > { %4525 = shalt.err (!%p4522_p1)
}
 0x12b   : > { %s4526_s22 = scalar_lea.vmem %s672_s6, 1024  ;;  %p4534_p9 = scmp.lt.s32.totalorder %s672_s6, %s672_s6 }
 0x12c   : > { %p4527_p4 = scmp.ne.s32.totalorder %s672_s6, %s4526_s22  ;;  %p4535_p10 = scmp.lt.s32.totalorder %s4526_s22, %s4526_s22 }
 0x12e   : > { %p4529_p6 = pnand %p4527_p4, %p4872_p7  ;;  %p4536_p11 = por %p4535_p10, %p4534_p9 }
 0x130   : > { %p4530_p8 = pneg %p4529_p6 }
 0x132   : > { %p4537_p12 = pnand %p4536_p11, %p4530_p8 }
 0x134   : > { %4540 = shalt.err (!%p4537_p12)
}
 0x135   : > { %3986 = dma.hbm_to_vmem [thread:$0]  (!%p4856_p5), %s5508_s13, 1024, %s672_s6, [#allocation15], %s4701_s26, %s4701_s26, %s4702_s2  }
 0x136   : > { %s4711_s25 = smov [#allocation19]   ;;  %s4712_s8 = smov [#allocation22]  }
 0x137   : > { %s697_s23 = sshll.u32 %s4711_s25, 4  ;;  %s721_s3 = sshll.u32 %s4712_s8, 4  ;;  %s698_s23 = int_to_ptr.vmem [resolvable:$true] %s697_s23  ;;  %s722_s3 = int_to_ptr.vmem [resolvable:$true] %s721_s3 }
 0x138   : > { %s4541_s28 = scalar_lea.hbm %s5510_s15, 1024 }
 0x139   : > { %p4542_p2 = scmp.ne.s32.totalorder %s5510_s15, %s4541_s28  ;;  %p4548_p0 = scmp.lt.u32.totalorder %s4541_s28, %s5510_s15 }
 0x13b   : > { %p4544_p3 = pnand %p4542_p2, %p4872_p7 }
 0x13d   : > { %p4545_p13 = pneg %p4544_p3 }
 0x13f   : > { %p4550_p1 = pnand %p4548_p0, %p4545_p13 }
 0x141   : > { %4553 = shalt.err (!%p4550_p1)
}
 0x142   : > { %s4554_s6 = scalar_lea.vmem %s698_s23, 1024  ;;  %p4562_p9 = scmp.lt.s32.totalorder %s698_s23, %s698_s23 }
 0x143   : > { %p4555_p4 = scmp.ne.s32.totalorder %s698_s23, %s4554_s6  ;;  %p4563_p10 = scmp.lt.s32.totalorder %s4554_s6, %s4554_s6 }
 0x145   : > { %p4557_p6 = pnand %p4555_p4, %p4872_p7  ;;  %p4564_p11 = por %p4563_p10, %p4562_p9 }
 0x147   : > { %p4558_p8 = pneg %p4557_p6 }
 0x149   : > { %p4565_p12 = pnand %p4564_p11, %p4558_p8 }
 0x14b   : > { %4568 = shalt.err (!%p4565_p12)
}
 0x14c   : > { %3992 = dma.hbm_to_vmem [thread:$0]  (!%p4856_p5), %s5510_s15, 1024, %s698_s23, [#allocation18], %s4701_s26, %s4701_s26, %s4702_s2  }
 0x14d   : > { %s4569_s20 = scalar_lea.hbm %s5512_s17, 1024 }
 0x14e   : > { %p4570_p2 = scmp.ne.s32.totalorder %s5512_s17, %s4569_s20  ;;  %p4576_p0 = scmp.lt.u32.totalorder %s4569_s20, %s5512_s17 }
 0x150   : > { %p4572_p3 = pnand %p4570_p2, %p4872_p7 }
 0x152   : > { %p4573_p13 = pneg %p4572_p3 }
 0x154   : > { %p4578_p1 = pnand %p4576_p0, %p4573_p13 }
 0x156   : > { %4581 = shalt.err (!%p4578_p1)
}
 0x157   : > { %s4582_s30 = scalar_lea.vmem %s722_s3, 1024  ;;  %p4590_p9 = scmp.lt.s32.totalorder %s722_s3, %s722_s3 }
 0x158   : > { %p4583_p4 = scmp.ne.s32.totalorder %s722_s3, %s4582_s30  ;;  %p4591_p10 = scmp.lt.s32.totalorder %s4582_s30, %s4582_s30 }
 0x15a   : > { %p4585_p6 = pnand %p4583_p4, %p4872_p7  ;;  %p4592_p11 = por %p4591_p10, %p4590_p9 }
 0x15c   : > { %p4586_p8 = pneg %p4585_p6 }
 0x15e   : > { %p4593_p12 = pnand %p4592_p11, %p4586_p8 }
 0x160   : > { %4596 = shalt.err (!%p4593_p12)
}
 0x161   : > { %3998 = dma.hbm_to_vmem [thread:$0]  (!%p4856_p5), %s5512_s17, 1024, %s722_s3, [#allocation21], %s4701_s26, %s4701_s26, %s4702_s2  }
 0x162   : > { %s4713_s5 = smov [#allocation25]   ;;  %s4714_s8 = smov [#allocation26]  }
 0x163   : > { %s745_s25 = sshll.u32 %s4713_s5, 4  ;;  %s759_s24 = sshll.u32 %s4714_s8, 4  ;;  %s746_s25 = int_to_ptr.vmem [resolvable:$true] %s745_s25  ;;  %s760_s24 = int_to_ptr.vmem [resolvable:$true] %s759_s24 }
 0x164   : > { %s4597_s4 = scalar_lea.hbm %s5514_s19, 1024 }
 0x165   : > { %p4598_p2 = scmp.ne.s32.totalorder %s5514_s19, %s4597_s4  ;;  %p4604_p0 = scmp.lt.u32.totalorder %s4597_s4, %s5514_s19 }
 0x167   : > { %p4600_p3 = pnand %p4598_p2, %p4872_p7 }
 0x169   : > { %p4601_p13 = pneg %p4600_p3 }
 0x16b   : > { %p4606_p1 = pnand %p4604_p0, %p4601_p13 }
 0x16d   : > { %4609 = shalt.err (!%p4606_p1)
}
 0x16e   : > { %s4610_s3 = scalar_lea.vmem %s746_s25, 1024  ;;  %p4618_p9 = scmp.lt.s32.totalorder %s746_s25, %s746_s25 }
 0x16f   : > { %p4611_p4 = scmp.ne.s32.totalorder %s746_s25, %s4610_s3  ;;  %p4619_p10 = scmp.lt.s32.totalorder %s4610_s3, %s4610_s3 }
 0x171   : > { %p4613_p6 = pnand %p4611_p4, %p4872_p7  ;;  %p4620_p11 = por %p4619_p10, %p4618_p9 }
 0x173   : > { %p4614_p8 = pneg %p4613_p6 }
 0x175   : > { %p4621_p12 = pnand %p4620_p11, %p4614_p8 }
 0x177   : > { %4624 = shalt.err (!%p4621_p12)
}
 0x178   : > { %4004 = dma.hbm_to_vmem [thread:$0]  (!%p4856_p5), %s5514_s19, 1024, %s746_s25, [#allocation24], %s4701_s26, %s4701_s26, %s4702_s2  }
 0x179   : > { %s5548_s28 = sld [smem:[#allocation48_spill]] }
 0x17f   : > { %s4625_s4 = scalar_lea.hbm %s5548_s28, 16 }
 0x180   : > { %p4626_p2 = scmp.ne.s32.totalorder %s5548_s28, %s4625_s4  ;;  %p4632_p0 = scmp.lt.u32.totalorder %s4625_s4, %s5548_s28 }
 0x182   : > { %p4628_p3 = pnand %p4626_p2, %p4872_p7 }
 0x184   : > { %p4629_p13 = pneg %p4628_p3 }
 0x186   : > { %p4634_p1 = pnand %p4632_p0, %p4629_p13 }
 0x188   : > { %4637 = shalt.err (!%p4634_p1)
}
 0x189   : > { %s4638_s3 = scalar_lea.vmem %s760_s24, 16  ;;  %s4645_s26 = scalar_lea.vmem %s760_s24, 32 }
 0x18a   : > { %p4639_p4 = scmp.ne.s32.totalorder %s760_s24, %s4638_s3  ;;  %p4646_p9 = scmp.lt.s32.totalorder %s760_s24, %s760_s24 }
 0x18b   : > { %p4647_p10 = scmp.lt.s32.totalorder %s4645_s26, %s4638_s3 }
 0x18c   : > { %p4641_p6 = pnand %p4639_p4, %p4872_p7 }
 0x18d   : > { %p4648_p11 = por %p4647_p10, %p4646_p9 }
 0x18e   : > { %p4642_p8 = pneg %p4641_p6 }
 0x190   : > { %p4649_p12 = pnand %p4648_p11, %p4642_p8 }
 0x192   : > { %4652 = shalt.err (!%p4649_p12)
}
 0x193   : > { %4007 = dma.hbm_to_vmem [thread:$0]  (!%p4856_p5), %s5548_s28, 16, %s760_s24, [#allocation27]  }
 0x194   : > { %s5549_s6 = sld [smem:[#allocation39_spill]] }
 0x19a   : > { %p5550_p2 = scmp.ne.s32.totalorder %s5549_s6, 0 }
 0x19b   : > { %s5551_s5 = sld [smem:[#allocation38_spill]] (!%p5550_p2) }
 0x19c   : > { %792 = sbr.rel (%p5550_p2) target bundleno = 3957 (0xf75), region = 104 }
 0x1a1   : > { %p5552_p3 = scmp.eq.s32.totalorder (!%p5550_p2), %s5551_s5, 0 }
 0x1a3   : > { %4658 = dma.done.wait (%p5552_p3), [#allocation4], 1024   ;;  %p5553_p7 = pmov %p5552_p3 }
 0x1a4   : > { %p5554_p13 = pmov %p5552_p3 }
 0x1a5   : > { %4660 = vsyncadd (%p5553_p7), [#allocation4], 4294966272 }
 0x1a6   : > { %4662 = dma.done.wait (%p5554_p13), [#allocation6], 1040   ;;  %p5555_p0 = pmov %p5552_p3 }
 0x1a8   : > { %4664 = vsyncadd (%p5555_p0), [#allocation6], 4294966256  ;;  %p5556_p1 = pmov %p5555_p0 }
 0x1a9   : > { %p5557_p5 = pmov %p5555_p0 }
 0x1aa   : > { %4666 = dma.done.wait (%p5556_p1), [#allocation9], 3328  }
 0x1ab   : > { %4668 = vsyncadd (%p5557_p5), [#allocation9], 4294963968  ;;  %p5558_p4 = pmov %p5555_p0 }
 0x1ac   : > { %p5559_p6 = pmov %p5555_p0 }
 0x1ad   : > { %4670 = dma.done.wait (%p5558_p4), [#allocation12], 5184  }
 0x1ae   : > { %4672 = vsyncadd (%p5559_p6), [#allocation12], 4294962112  ;;  %p5560_p8 = pmov %p5555_p0 }
 0x1af   : > { %p5561_p9 = pmov %p5555_p0 }
 0x1b0   : > { %4674 = dma.done.wait (%p5560_p8), [#allocation15], 1088  }
 0x1b1   : > { %4676 = vsyncadd (%p5561_p9), [#allocation15], 4294966208  ;;  %p5562_p10 = pmov %p5555_p0 }
 0x1b2   : > { %p5563_p11 = pmov %p5555_p0 }
 0x1b3   : > { %4678 = dma.done.wait (%p5562_p10), [#allocation18], 2048  }
 0x1b4   : > { %4680 = vsyncadd (%p5563_p11), [#allocation18], 4294965248  ;;  %p5564_p12 = pmov %p5555_p0 }
 0x1b5   : > { %p5565_p2 = pmov %p5555_p0 }
 0x1b6   : > { %4682 = dma.done.wait (%p5564_p12), [#allocation21], 1088  }
 0x1b7   : > { %4684 = vsyncadd (%p5565_p2), [#allocation21], 4294966208  ;;  %p5566_p3 = pmov %p5555_p0 }
 0x1b8   : > { %p5567_p7 = pmov %p5555_p0 }
 0x1b9   : > { %4686 = dma.done.wait (%p5566_p3), [#allocation24], 1088  }
 0x1ba   : > { %4688 = vsyncadd (%p5567_p7), [#allocation24], 4294966208  ;;  %p5568_p13 = pmov %p5555_p0 }
 0x1bc   : > { %4690 = dma.done.wait (%p5568_p13), [#allocation27], 16  }
 0x1bd   : > { %4692 = vsyncadd (%p5555_p0), [#allocation27], 4294967280  ;;  %v4715_v0 = vmov 0.0   ;;  %vm4716_vm0 = vmmov 0   ;;  %s5569_s24 = sld [smem:[#allocation43_spill]]  ;;  %p923_p1 = scmp.lt.s32.totalorder %s5551_s5, 1  ;;  %v1485_v48 = vlaneseq }
 0x1be   : > { %3663 = vmatprep.subr.bf16.mxu0 %v4715_v0  ;;  %3679 = vmatprep.mubr.msk.bf16.mxu0 %vm4716_vm0, %v4715_v0  ;;  %v4077_v4 = vld [vmem:[#allocation3] sm:$0xff]   ;;  %v4078_v6 = vld [vmem:[#allocation3 + $0x8] sm:$0xff]   ;;  %v4079_v8 = vld [vmem:[#allocation3 + $0x10] sm:$0xff]   ;;  %s5570_s20 = sld [smem:[#allocation41_spill]]  ;;  %s5571_s3 = sld [smem:[#allocation40_spill]]  ;;  %vm1168_vm1 = vcmask 1043456  }
 0x1bf   : > { %3683 = vmatprep.subr.bf16.mxu1 %v4715_v0  ;;  %3699 = vmatprep.mubr.msk.bf16.mxu1 %vm4716_vm0, %v4715_v0  ;;  %s5582_s5 = smov (!%p923_p1, %s5551_s5), 1  ;;  %v4080_v10 = vld [vmem:[#allocation3 + $0x18] sm:$0xff]   ;;  %v4081_v12 = vld [vmem:[#allocation3 + $0x20] sm:$0xff]   ;;  %v4082_v15 = vld [vmem:[#allocation3 + $0x28] sm:$0xff]   ;;  %vm1164_vm2 = vcmask 64512   ;;  %s5572_s6 = sld [smem:[#allocation45_spill]] }
 0x1c0   : > { %3684 = vmatpush3.bf16.msra.mxu1 %v4077_v4  ;;  %s3325_s26 = sshll.u32 %s5582_s5, 3  ;;  %v4083_v17 = vld [vmem:[#allocation3 + $0x30] sm:$0xff]   ;;  %v4084_v18 = vld [vmem:[#allocation3 + $0x38] sm:$0xff]   ;;  %v4085_v24 = vld [vmem:[#allocation5] sm:$0xff]   ;;  %s5573_s8 = sld [smem:[#allocation42_spill]]  ;;  %v5327_v50 = vshrl.u32 %v1485_v48, 7 }
 0x1c1   : > { %3685 = vmatprep.subr.bf16.mxu1 %v4715_v0  ;;  %v4086_v25 = vld [vmem:[#allocation5 + $0x8] sm:$0xff]   ;;  %v4087_v26 = vld [vmem:[#allocation5 + $0x10] sm:$0xff]   ;;  %v4088_v27 = vld [vmem:[#allocation5 + $0x18] sm:$0xff]   ;;  %vm1556_vm7 = vcmask 261120   ;;  %vm4717_vm12 = vmmov 1   ;;  %s5578_s30 = sld [smem:[#allocation50_spill]] }
 0x1c2   : > { %v4089_v28 = vld [vmem:[#allocation5 + $0x20] sm:$0xff]   ;;  %v4090_v29 = vld [vmem:[#allocation5 + $0x28] sm:$0xff]   ;;  %v4091_v38 = vld [vmem:[#allocation5 + $0x30] sm:$0xff]   ;;  %v5331_v51 = vadd.s32 8, %v5327_v50  ;;  %v1488_v52 = vadd.s32 16, %v5327_v50  ;;  %v1489_v55 = vadd.s32 24, %v5327_v50 }
 0x1c3   : > { %v4069_v1 = vld [vmem:[%s5569_s24] sm:$0xff]   ;;  %v4070_v2 = vld [vmem:[%s5569_s24 + $0x8] sm:$0xff]   ;;  %v4071_v3 = vld [vmem:[%s5569_s24 + $0x10] sm:$0xff]   ;;  %vm1603_vm9 = vcmp.lt.s32.totalorder %v5327_v50, 1  ;;  %vm1624_vm10 = vcmp.lt.s32.totalorder %v5327_v50, 7  ;;  %vm1939_vm15 = vcmp.lt.s32.totalorder %v5327_v50, 2 }
 0x1c4   : > { %3664 = vmatpush3.bf16.msra.mxu0 %v4069_v1  ;;  %v4072_v5 = vld [vmem:[%s5569_s24 + $0x18] sm:$0xff]   ;;  %v4073_v7 = vld [vmem:[%s5569_s24 + $0x20] sm:$0xff]   ;;  %3686 = vmatpush3.bf16.msra.mxu1 %v4078_v6  ;;  %v4074_v9 = vld [vmem:[%s5569_s24 + $0x28] sm:$0xff]   ;;  %s930_s4 = scalar_lea.vmem %s5570_s20, %s3325_s26  ;;  %s926_s2 = scalar_lea.vmem %s5571_s3, %s3325_s26 }
 0x1c5   : > { %3665 = vmatprep.subr.bf16.mxu0 %v4715_v0  ;;  %3687 = vmatprep.subr.bf16.mxu1 %v4715_v0  ;;  %v4075_v11 = vld [vmem:[%s5569_s24 + $0x30] sm:$0xff]   ;;  %v4076_v13 = vld [vmem:[%s5569_s24 + $0x38] sm:$0xff]   ;;  %v945_v14 = vld [vmem:[%s930_s4] sm:$0xff]  ;;  %s3495_s4 = sshll.u32 %s5582_s5, 4  ;;  %s5579_s26 = sld [smem:[#allocation49_spill]] }
 0x1c6   : > { %v946_v16 = vpack.c.bf16 %v945_v14, %v945_v14  ;;  %v943_v30 = vld [vmem:[%s926_s2] sm:$0xff]  ;;  %v4092_v39 = vld [vmem:[#allocation5 + $0x38] sm:$0xff]   ;;  %s933_s20 = scalar_lea.vmem %s5573_s8, %s5582_s5 }
 0x1c7   : > { %v944_v35 = vpack.c.bf16 %v943_v30, %v943_v30  ;;  %v3345_v40 = vld [vmem:[%s5572_s6] ss:$0 sm:$0xff]  ;;  %v4096_v4 = vld [vmem:[#allocation17 + $0x18] sm:$0xff]   ;;  %v4098_v6 = vld [vmem:[#allocation17 + $0x28] sm:$0xff]   ;;  %s941_s23 = scalar_lea.vmem %s5578_s30, %s3495_s4 }
 0x1c8   : > { %3666 = vmatpush3.bf16.msra.mxu0 %v4070_v2  ;;  %3688 = vmatpush3.bf16.msra.mxu1 %v4079_v8  ;;  %v3365_v49 = vld [vmem:[%s933_s20] ss:$0 sm:$0xff]  ;;  %v4094_v2 = vld [vmem:[#allocation17 + $0x8] sm:$0xff]   ;;  %v4100_v8 = vld [vmem:[#allocation17 + $0x38] sm:$0xff]  }
 0x1c9   : > { %3667 = vmatprep.subr.bf16.mxu0 %v4715_v0  ;;  %3689 = vmatprep.subr.bf16.mxu1 %v4715_v0  ;;  %vm1495_vm3 = vcmp.eq.s32.totalorder %v5327_v50, %v3365_v49  ;;  %vm1496_vm4 = vcmp.eq.s32.totalorder %v5331_v51, %v3365_v49  ;;  %vm1497_vm5 = vcmp.eq.s32.totalorder %v1488_v52, %v3365_v49  ;;  %v4093_v1 = vld [vmem:[#allocation17] sm:$0xff]   ;;  %v4110_v14 = vld [vmem:[#allocation10 + $0x10] sm:$0xff]  }
 0x1ca   : > { %v3366_v53 = vsel %vm1495_vm3, 1.0, %v4715_v0  ;;  %v3367_v54 = vsel %vm1496_vm4, 1.0, %v4715_v0  ;;  %v3368_v56 = vsel %vm1497_vm5, 1.0, %v4715_v0  ;;  %vm1498_vm6 = vcmp.eq.s32.totalorder %v1489_v55, %v3365_v49 }
 0x1cb   : > { %1507 = vxpose.xlu0.b32.start [1/4] (short) (narrow) %v3366_v53, 16  ;;  %v3369_v57 = vsel %vm1498_vm6, 1.0, %v4715_v0  ;;  %v1606_v55 = vadd.s32 4294967295, %v5327_v50  ;;  %s936_s25 = scalar_lea.vmem %s5579_s26, %s5582_s5 }
 0x1cc   : > { %3668 = vmatpush3.bf16.msra.mxu0 %v4071_v3  ;;  %3690 = vmatpush3.bf16.msra.mxu1 %v4080_v10  ;;  %v4095_v3 = vld [vmem:[#allocation17 + $0x10] sm:$0xff]   ;;  %v4104_v10 = vld [vmem:[#allocation10] sm:$0xff]  }
 0x1cd   : > { %3669 = vmatprep.subr.bf16.mxu0 %v4715_v0  ;;  %3691 = vmatprep.subr.bf16.mxu1 %v4715_v0  ;;  %vm1608_vm8 = vcmp.ge.s32.totalorder %v1606_v55, 0 }
 0x1ce   : > { %vm5373_vm13 = vmpackc.low %vm4717_vm12, %vm1608_vm8 }
 0x1cf   : > { %1508 = vxpose.xlu0.b32.cont [2/4] (short) (narrow) %v3367_v54, 16 }
 0x1d0   : > { %3670 = vmatpush3.bf16.msra.mxu0 %v4072_v5  ;;  %3692 = vmatpush3.bf16.msra.mxu1 %v4081_v12  ;;  %v4097_v5 = vld [vmem:[#allocation17 + $0x20] sm:$0xff]  }
 0x1d1   : > { %3671 = vmatprep.subr.bf16.mxu0 %v4715_v0  ;;  %3693 = vmatprep.subr.bf16.mxu1 %v4715_v0  ;;  %v4107_v12 = vld [vmem:[#allocation10 + $0x8] sm:$0xff]  }
 0x1d3   : > { %1509 = vxpose.xlu0.b32.cont [3/4] (short) (narrow) %v3368_v56, 16  ;;  %v1628_v56 = vadd.s32 1, %v5331_v51 }
 0x1d4   : > { %3672 = vmatpush3.bf16.msra.mxu0 %v4073_v7  ;;  %3694 = vmatpush3.bf16.msra.mxu1 %v4082_v15  ;;  %v4099_v7 = vld [vmem:[#allocation17 + $0x30] sm:$0xff]  }
 0x1d5   : > { %3673 = vmatprep.subr.bf16.mxu0 %v4715_v0  ;;  %3695 = vmatprep.subr.bf16.mxu1 %v4715_v0  ;;  %v4112_v15 = vld [vmem:[#allocation10 + $0x58] sm:$0xff]   ;;  %vm1632_vm11 = vcmp.lt.s32.totalorder %v1628_v56, 16 }
 0x1d6   : > { %vm5386_vm14 = vmpackc.low %vm1632_vm11, %vm4717_vm12 }
 0x1d7   : > { %1510 = vxpose.xlu0.b32.end [4/4] (short) (narrow) %v3369_v57, 16 }
 0x1d8   : > { %3674 = vmatpush3.bf16.msra.mxu0 %v4074_v9  ;;  %3696 = vmatpush3.bf16.msra.mxu1 %v4083_v17  ;;  %v4103_v9 = vld [vmem:[#allocation10 + $0x40] sm:$0xff]  }
 0x1d9   : > { %3675 = vmatprep.subr.bf16.mxu0 %v4715_v0  ;;  %3697 = vmatprep.subr.bf16.mxu1 %v4715_v0  ;;  %v4115_v17 = vld [vmem:[#allocation10 + $0x60] sm:$0xff]  }
 0x1dc   : > { %3676 = vmatpush3.bf16.msra.mxu0 %v4075_v11  ;;  %3698 = vmatpush3.bf16.msra.mxu1 %v4084_v18  ;;  %v4106_v11 = vld [vmem:[#allocation10 + $0x48] sm:$0xff]   ;;  %v4116_v18 = vld [vmem:[#allocation10 + $0x20] sm:$0xff]  }
 0x1dd   : > { %3677 = vmatprep.subr.bf16.mxu0 %v4715_v0  ;;  %3709 = vmatprep.subr.bf16.mxu1 %v4715_v0 }
 0x1e0   : > { %3678 = vmatpush3.bf16.msra.mxu0 %v4076_v13  ;;  %v4109_v13 = vld [vmem:[#allocation10 + $0x50] sm:$0xff]  }
 0x1e1   : > { %3703 = vmatprep.subr.bf16.mxu0 %v4715_v0 }
 0x1e3   : > { %3680 = vmatmul.mubr.bf16.vlgmr.msra.gmra.mrb[0].mxu0 %v946_v16  ;;  %v4113_v16 = vld [vmem:[#allocation10 + $0x18] sm:$0xff]  }
 0x1e4   : > { %3705 = vmatprep.mubr.msk.bf16.mxu0 %vm4716_vm0, %v4715_v0 }
 0x2b6   : > { %v1045_v19 = vpop.f32.mrb[0].mxu0 }
 0x2b7   : > { %v1051_v20 = vpack.c.bf16 %v1045_v19, %v1045_v19  ;;  %v3681_v21 = vpop.f32.mrb[1].mxu0  ;;  %v3355_v19 = vld [vmem:[#allocation7] ss:$0 sm:$0xff] }
 0x2b8   : > { %v1048_v22 = vpop.f32.mrb[2].mxu0 }
 0x2b9   : > { %v3682_v23 = vpop.f32.mrb[3].mxu0  ;;  %3700 = vmatmul.mubr.bf16.vlgmr.msra.gmra.mrb[0].mxu1 %v1051_v20 }
 0x2ba   : > { %3725 = vmatprep.mubr.msk.bf16.mxu1 %vm4716_vm0, %v4715_v0  ;;  %3710 = vmatpush3.bf16.msra.mxu1 %v4085_v24 }
 0x2bb   : > { %3711 = vmatprep.subr.bf16.mxu1 %v4715_v0 }
 0x2be   : > { %3712 = vmatpush3.bf16.msra.mxu1 %v4086_v25 }
 0x2bf   : > { %3713 = vmatprep.subr.bf16.mxu1 %v4715_v0 }
 0x2c2   : > { %3714 = vmatpush3.bf16.msra.mxu1 %v4087_v26  ;;  %v1523_v26 = vpop.trf.xlu0 }
 0x2c3   : > { %3715 = vmatprep.subr.bf16.mxu1 %v4715_v0 }
 0x2c6   : > { %3716 = vmatpush3.bf16.msra.mxu1 %v4088_v27  ;;  %v4101_v27 = vld [vmem:[#allocation8] sm:$0xff]   ;;  %v1524_v30 = vpop.trf.xlu0 }
 0x2c7   : > { %3717 = vmatprep.subr.bf16.mxu1 %v4715_v0 }
 0x2ca   : > { %3718 = vmatpush3.bf16.msra.mxu1 %v4089_v28 }
 0x2cb   : > { %3719 = vmatprep.subr.bf16.mxu1 %v4715_v0 }
 0x2ce   : > { %3720 = vmatpush3.bf16.msra.mxu1 %v4090_v29  ;;  %v4102_v29 = vld [vmem:[#allocation8 + $0x8] sm:$0xff]  }
 0x2cf   : > { %3721 = vmatprep.subr.bf16.mxu1 %v4715_v0 }
 0x2d2   : > { %3722 = vmatpush3.bf16.msra.mxu1 %v4091_v38  ;;  %v4119_v38 = vld [vmem:[#allocation10 + $0x28] sm:$0xff]  }
 0x2d3   : > { %3723 = vmatprep.subr.bf16.mxu1 %v4715_v0 }
 0x2d6   : > { %3724 = vmatpush3.bf16.msra.mxu1 %v4092_v39  ;;  %v4120_v39 = vld [vmem:[#allocation10 + $0xa8] sm:$0xff]  }
 0x2d7   : > { %3539 = vmatprep.subr.bf16.mxu1 %v4103_v9  ;;  %v4128_v9 = vld [vmem:[#allocation13] sm:$0xff]  }
 0x38c   : > { %v1150_v31 = vpop.f32.mrb[0].mxu1 }
 0x38d   : > { %v1156_v32 = vpack.c.bf16 %v1150_v31, %v1150_v31  ;;  %v3701_v33 = vpop.f32.mrb[1].mxu1  ;;  %v4105_v31 = vld [vmem:[#allocation10 + $0x80] sm:$0xff]  }
 0x38e   : > { %v1153_v34 = vpop.f32.mrb[2].mxu1  ;;  %v4108_v33 = vld [vmem:[#allocation10 + $0x88] sm:$0xff]  }
 0x38f   : > { %v1170_v36 = vsel %vm1168_vm1, %v1156_v32, 0  ;;  %v3702_v37 = vpop.f32.mrb[3].mxu1  ;;  %v1539_v32 = vpack.c.bf16 %v1524_v30, %v1523_v26  ;;  %v4111_v34 = vld [vmem:[#allocation10 + $0x90] sm:$0xff]   ;;  %v4144_v26 = vld [vmem:[#allocation13 + $0x20] sm:$0xff]  }
 0x390   : > { %3704 = vmatpush3.bf16.msra.mxu0 %v1170_v36  ;;  %v4117_v36 = vld [vmem:[#allocation10 + $0xa0] sm:$0xff]   ;;  %v4118_v37 = vld [vmem:[#allocation10 + $0x68] sm:$0xff]  }
 0x391   : > { %3729 = vmatprep.subr.bf16.mxu0 %v4715_v0  ;;  %v4148_v30 = vld [vmem:[#allocation13 + $0x28] sm:$0xff]  }
 0x393   : > { %3706 = vmatmul.mubr.msk.bf16.vlgmr.msra.gmra.mrb[4].mxu0 %vm1164_vm2, %v944_v35 }
 0x394   : > { %3731 = vmatprep.mubr.msk.bf16.mxu0 %vm4716_vm0, %v4715_v0 }
 0x466   : > { %v1206_v41 = vpop.f32.mrb[4].mxu0 }
 0x467   : > { %v1207_v42 = vadd.f32 %v3345_v40, %v1206_v41  ;;  %v3707_v43 = vpop.f32.mrb[5].mxu0  ;;  %v4121_v40 = vld [vmem:[#allocation10 + $0x70] sm:$0xff]  }
 0x468   : > { %v1209_v44 = vpop.f32.mrb[6].mxu0  ;;  %v4122_v41 = vld [vmem:[#allocation10 + $0x30] sm:$0xff]   ;;  %v4124_v43 = vld [vmem:[#allocation10 + $0x78] sm:$0xff]  }
 0x469   : > { %v1212_v45 = vmax.f32 %v1207_v42, 0.0  ;;  %v3708_v46 = vpop.f32.mrb[7].mxu0  ;;  %v4123_v42 = vld [vmem:[#allocation10 + $0xb0] sm:$0xff]   ;;  %v4125_v44 = vld [vmem:[#allocation10 + $0x38] sm:$0xff]  }
 0x46a   : > { %v4127_v46 = vld [vmem:[#allocation13 + $0x40] sm:$0xff]  }
 0x46b   : > { %v1213_v47 = vpack.c.bf16 %v1212_v45, %v1212_v45  ;;  %v4126_v45 = vld [vmem:[#allocation10 + $0xb8] sm:$0xff]  }
 0x46d   : > { %3726 = vmatmul.mubr.bf16.vlgmr.msra.gmra.mrb[4].mxu1 %v1213_v47  ;;  %v4129_v47 = vld [vmem:[#allocation13 + $0xc0] sm:$0xff]  }
 0x46e   : > { %3540 = vmatpush3.bf16.msra.mxu1 %v4104_v10  ;;  %v4130_v10 = vld [vmem:[#allocation13 + $0x80] sm:$0xff]  }
 0x46f   : > { %3541 = vmatprep.subr.bf16.mxu1 %v4106_v11 }
 0x472   : > { %3542 = vmatpush3.bf16.msra.mxu1 %v4107_v12 }
 0x473   : > { %3543 = vmatprep.subr.bf16.mxu1 %v4109_v13  ;;  %v4131_v13 = vld [vmem:[#allocation13 + $0x48] sm:$0xff]  }
 0x476   : > { %3544 = vmatpush3.bf16.msra.mxu1 %v4110_v14  ;;  %v4133_v14 = vld [vmem:[#allocation13 + $0xc8] sm:$0xff]  }
 0x477   : > { %3545 = vmatprep.subr.bf16.mxu1 %v4112_v15  ;;  %v4132_v15 = vld [vmem:[#allocation13 + $0x8] sm:$0xff]  }
 0x47a   : > { %3546 = vmatpush3.bf16.msra.mxu1 %v4113_v16  ;;  %v4134_v16 = vld [vmem:[#allocation13 + $0x88] sm:$0xff]  }
 0x47b   : > { %3547 = vmatprep.subr.bf16.mxu1 %v4115_v17  ;;  %v4135_v17 = vld [vmem:[#allocation13 + $0x50] sm:$0xff]  }
 0x47e   : > { %3548 = vmatpush3.bf16.msra.mxu1 %v4116_v18  ;;  %v4137_v18 = vld [vmem:[#allocation13 + $0xd0] sm:$0xff]  }
 0x47f   : > { %3549 = vmatprep.subr.bf16.mxu1 %v4118_v37  ;;  %v4155_v37 = vld [vmem:[#allocation13 + $0x78] sm:$0xff]  }
 0x482   : > { %3550 = vmatpush3.bf16.msra.mxu1 %v4119_v38  ;;  %v4156_v38 = vld [vmem:[#allocation13 + $0x38] sm:$0xff]  }
 0x483   : > { %3551 = vmatprep.subr.bf16.mxu1 %v4121_v40  ;;  %v4158_v40 = vld [vmem:[#allocation13 + $0xb8] sm:$0xff]  }
 0x486   : > { %3552 = vmatpush3.bf16.msra.mxu1 %v4122_v41 }
 0x487   : > { %3553 = vmatprep.subr.bf16.mxu1 %v4124_v43  ;;  %v3373_v43 = vld [vmem:[#allocation11] ss:$0 sm:$0xff] }
 0x48a   : > { %3554 = vmatpush3.bf16.msra.mxu1 %v4125_v44 }
 0x48b   : > { %3570 = vmatprep.subr.bf16.mxu1 %v4127_v46 }
 0x540   : > { %v1312_v58 = vpop.f32.mrb[4].mxu1 }
 0x541   : > { %v1318_v59 = vpack.c.bf16 %v1312_v58, %v1312_v58  ;;  %v3727_v60 = vpop.f32.mrb[5].mxu1 }
 0x542   : > { %v1315_v61 = vpop.f32.mrb[6].mxu1 }
 0x543   : > { %v1327_v62 = vsel %vm1168_vm1, %v1318_v59, 0  ;;  %v3728_v63 = vpop.f32.mrb[7].mxu1 }
 0x544   : > { %3730 = vmatpush3.bf16.msra.mxu0 %v1327_v62 }
 0x545   : > { %3735 = vmatprep.subr.bf16.mxu0 %v4715_v0 }
 0x547   : > { %3732 = vmatmul.mubr.msk.bf16.vlgmr.msra.gmra.mrb[8].mxu0 %vm1164_vm2, %v944_v35  ;;  %v4114_v35 = vld [vmem:[#allocation10 + $0x98] sm:$0xff]   ;;  %vm1974_vm2 = vcmp.lt.s32.totalorder %v5327_v50, 6 }
 0x548   : > { %3736 = vmatpush3.bf16.msra.mxu0 %v4093_v1  ;;  %3751 = vmatprep.mubr.msk.bf16.mxu0 %vm4716_vm0, %v4715_v0 }
 0x549   : > { %3737 = vmatprep.subr.bf16.mxu0 %v4715_v0 }
 0x54c   : > { %3738 = vmatpush3.bf16.msra.mxu0 %v4094_v2 }
 0x54d   : > { %3739 = vmatprep.subr.bf16.mxu0 %v4715_v0 }
 0x550   : > { %3740 = vmatpush3.bf16.msra.mxu0 %v4095_v3  ;;  %v4162_v3 = vld [vmem:[#allocation13 + $0x118] sm:$0xff]  }
 0x551   : > { %3741 = vmatprep.subr.bf16.mxu0 %v4715_v0 }
 0x554   : > { %3742 = vmatpush3.bf16.msra.mxu0 %v4096_v4 }
 0x555   : > { %3743 = vmatprep.subr.bf16.mxu0 %v4715_v0 }
 0x558   : > { %3744 = vmatpush3.bf16.msra.mxu0 %v4097_v5 }
 0x559   : > { %3745 = vmatprep.subr.bf16.mxu0 %v4715_v0 }
 0x55c   : > { %3746 = vmatpush3.bf16.msra.mxu0 %v4098_v6 }
 0x55d   : > { %3747 = vmatprep.subr.bf16.mxu0 %v4715_v0 }
 0x560   : > { %3748 = vmatpush3.bf16.msra.mxu0 %v4099_v7 }
 0x561   : > { %3749 = vmatprep.subr.bf16.mxu0 %v4715_v0 }
 0x564   : > { %3750 = vmatpush3.bf16.msra.mxu0 %v4100_v8  ;;  %v4163_v8 = vld [vmem:[#allocation13 + $0x120] sm:$0xff]  }
 0x565   : > { %3755 = vmatprep.subr.bf16.mxu0 %v4715_v0 }
 0x61a   : > { %v1363_v20 = vpop.f32.mrb[8].mxu0 }
 0x61b   : > { %v1364_v21 = vadd.f32 %v3355_v19, %v1363_v20  ;;  %v3733_v22 = vpop.f32.mrb[9].mxu0  ;;  %v4136_v19 = vld [vmem:[#allocation13 + $0x10] sm:$0xff]  }
 0x61c   : > { %v1366_v23 = vpop.f32.mrb[10].mxu0  ;;  %v4138_v20 = vld [vmem:[#allocation13 + $0x90] sm:$0xff]   ;;  %v4140_v22 = vld [vmem:[#allocation13 + $0x18] sm:$0xff]  }
 0x61d   : > { %v1369_v24 = vmax.f32 %v1364_v21, 0.0  ;;  %v3734_v25 = vpop.f32.mrb[11].mxu0  ;;  %v4139_v21 = vld [vmem:[#allocation13 + $0x58] sm:$0xff]  }
 0x61e   : > { %v4141_v23 = vld [vmem:[#allocation13 + $0xd8] sm:$0xff]   ;;  %v4143_v25 = vld [vmem:[#allocation13 + $0x60] sm:$0xff]  }
 0x61f   : > { %v1370_v28 = vpack.c.bf16 %v1369_v24, %v1369_v24  ;;  %v4142_v24 = vld [vmem:[#allocation13 + $0x98] sm:$0xff]  }
 0x621   : > { %3752 = vmatmul.mubr.bf16.vlgmr.msra.gmra.mrb[12].mxu0 %v1370_v28  ;;  %v4146_v28 = vld [vmem:[#allocation13 + $0xa0] sm:$0xff]  }
 0x622   : > { %3756 = vmatpush3.bf16.msra.mxu0 %v4101_v27  ;;  %3759 = vmatprep.mubr.msk.bf16.mxu0 %vm4716_vm0, %v4715_v0  ;;  %v4145_v27 = vld [vmem:[#allocation13 + $0xe0] sm:$0xff]  }
 0x623   : > { %3757 = vmatprep.subr.bf16.mxu0 %v4715_v0 }
 0x626   : > { %3758 = vmatpush3.bf16.msra.mxu0 %v4102_v29  ;;  %v4147_v29 = vld [vmem:[#allocation13 + $0x68] sm:$0xff]  }
 0x627   : > { %3763 = vmatprep.subr.bf16.mxu0 %v4715_v0 }
 0x629   : > { %3760 = vmatmul.mubr.msk.bf16.vlgmr.msra.gmra.mrb[16].mxu0 %vm1556_vm7, %v1539_v32  ;;  %v4150_v32 = vld [vmem:[#allocation13 + $0xa8] sm:$0xff]  }
 0x62a   : > { %3764 = vmatpush3.bf16.msra.mxu0 %v4105_v31  ;;  %3779 = vmatprep.mubr.msk.bf16.mxu0 %vm4716_vm0, %v4715_v0  ;;  %v4149_v31 = vld [vmem:[#allocation13 + $0xe8] sm:$0xff]  }
 0x62b   : > { %3765 = vmatprep.subr.bf16.mxu0 %v4715_v0 }
 0x62e   : > { %3766 = vmatpush3.bf16.msra.mxu0 %v4108_v33  ;;  %v4151_v33 = vld [vmem:[#allocation13 + $0x70] sm:$0xff]  }
 0x62f   : > { %3767 = vmatprep.subr.bf16.mxu0 %v4715_v0 }
 0x632   : > { %3768 = vmatpush3.bf16.msra.mxu0 %v4111_v34  ;;  %v4152_v34 = vld [vmem:[#allocation13 + $0x30] sm:$0xff]  }
 0x633   : > { %3769 = vmatprep.subr.bf16.mxu0 %v4715_v0 }
 0x636   : > { %3770 = vmatpush3.bf16.msra.mxu0 %v4114_v35  ;;  %v4153_v35 = vld [vmem:[#allocation13 + $0xf0] sm:$0xff]  }
 0x637   : > { %3771 = vmatprep.subr.bf16.mxu0 %v4715_v0 }
 0x63a   : > { %3772 = vmatpush3.bf16.msra.mxu0 %v4117_v36  ;;  %v4154_v36 = vld [vmem:[#allocation13 + $0xb0] sm:$0xff]  }
 0x63b   : > { %3773 = vmatprep.subr.bf16.mxu0 %v4715_v0 }
 0x63e   : > { %3774 = vmatpush3.bf16.msra.mxu0 %v4120_v39  ;;  %v4157_v39 = vld [vmem:[#allocation13 + $0xf8] sm:$0xff]  }
 0x63f   : > { %3775 = vmatprep.subr.bf16.mxu0 %v4715_v0 }
 0x642   : > { %3776 = vmatpush3.bf16.msra.mxu0 %v4123_v42 }
 0x643   : > { %3777 = vmatprep.subr.bf16.mxu0 %v4715_v0 }
 0x646   : > { %3778 = vmatpush3.bf16.msra.mxu0 %v4126_v45 }
 0x647   : > { %3592 = vmatprep.subr.bf16.mxu0 %v4129_v47 }
 0x6f4   : > { %v5366_v49 = vpop.f32.mrb[12].mxu0 }
 0x6f5   : > { %v3753_v52 = vpop.f32.mrb[13].mxu0 }
 0x6f6   : > { %v1472_v53 = vpop.f32.mrb[14].mxu0 }
 0x6f7   : > { %v3754_v54 = vpop.f32.mrb[15].mxu0 }
 0x6fc   : > { %v1594_v57 = vpop.f32.mrb[16].mxu0 }
 0x6fd   : > { %v3761_v58 = vpop.f32.mrb[17].mxu0  ;;  %v1601_v59 = vrot.slane %v1594_v57, 7  ;;  %v1622_v61 = vrot.slane %v1594_v57, 1 }
 0x6fe   : > { %v1597_v60 = vpop.f32.mrb[18].mxu0 }
 0x6ff   : > { %v1602_v62 = vrot.slane %v1597_v60, 7  ;;  %v1621_v63 = vpack.c.bf16 %v1597_v60, %v1594_v57  ;;  %v1623_v1 = vrot.slane %v1597_v60, 1  ;;  %v3762_v2 = vpop.f32.mrb[19].mxu0 }
 0x700   : > { %v1942_v2 = vadd.s32 4294967294, %v5327_v50  ;;  %v4161_v50 = vld [vmem:[#allocation13 + $0x110] sm:$0xff]  }
 0x701   : > { %v1604_v4 = vsel %vm1603_vm9, %v1601_v59, %v1602_v62  ;;  %v1605_v5 = vsel %vm1603_vm9, %v1602_v62, %v1601_v59  ;;  %v1625_v6 = vsel %vm1624_vm10, %v1622_v61, %v1623_v1  ;;  %v1626_v7 = vsel %vm1624_vm10, %v1623_v1, %v1622_v61  ;;  %1871 = vmatprep.mubr.bf16.mxu1 %v1621_v63  ;;  %v3404_v59 = vld [vmem:[#allocation11 + $0x1] ss:$0 sm:$0xff]  ;;  %v3405_v62 = vld [vmem:[#allocation11 + $0x2] ss:$0 sm:$0xff] }
 0x702   : > { %v3399_v11 = vpack.c.bf16 %v1604_v4, %v1605_v5  ;;  %v3402_v12 = vpack.c.bf16 %v1626_v7, %v1625_v6  ;;  %vm1944_vm1 = vcmp.ge.s32.totalorder %v1942_v2, 0 }
 0x703   : > { %vm3450_vm3 = vmpackc.low %vm4717_vm12, %vm1944_vm1 }
 0x704   : > { %3400 = vmatmul.mubr.msk.bf16.vlgmr.msra.gmra.mrb[8].mxu1 %vm5373_vm13, %v3399_v11  ;;  %3780 = vmatmul.mubr.msk.bf16.vlgmr.msra.gmra.mrb[20].mxu0 %vm5386_vm14, %v3402_v12 }
 0x705   : > { %3571 = vmatpush3.bf16.msra.mxu1 %v4128_v9  ;;  %3593 = vmatpush3.bf16.msra.mxu0 %v4130_v10 }
 0x706   : > { %3572 = vmatprep.subr.bf16.mxu1 %v4131_v13  ;;  %3594 = vmatprep.subr.bf16.mxu0 %v4133_v14 }
 0x709   : > { %3573 = vmatpush3.bf16.msra.mxu1 %v4132_v15  ;;  %3595 = vmatpush3.bf16.msra.mxu0 %v4134_v16 }
 0x70a   : > { %3574 = vmatprep.subr.bf16.mxu1 %v4135_v17  ;;  %3596 = vmatprep.subr.bf16.mxu0 %v4137_v18 }
 0x70d   : > { %3575 = vmatpush3.bf16.msra.mxu1 %v4136_v19  ;;  %3597 = vmatpush3.bf16.msra.mxu0 %v4138_v20 }
 0x70e   : > { %3576 = vmatprep.subr.bf16.mxu1 %v4139_v21  ;;  %3598 = vmatprep.subr.bf16.mxu0 %v4141_v23 }
 0x711   : > { %3577 = vmatpush3.bf16.msra.mxu1 %v4140_v22  ;;  %3599 = vmatpush3.bf16.msra.mxu0 %v4142_v24 }
 0x712   : > { %3578 = vmatprep.subr.bf16.mxu1 %v4143_v25  ;;  %3600 = vmatprep.subr.bf16.mxu0 %v4145_v27  ;;  %v4159_v25 = vld [vmem:[#allocation13 + $0x100] sm:$0xff]  }
 0x715   : > { %3579 = vmatpush3.bf16.msra.mxu1 %v4144_v26  ;;  %3601 = vmatpush3.bf16.msra.mxu0 %v4146_v28 }
 0x716   : > { %3580 = vmatprep.subr.bf16.mxu1 %v4147_v29  ;;  %3602 = vmatprep.subr.bf16.mxu0 %v4149_v31  ;;  %v4164_v31 = vld [vmem:[#allocation13 + $0x128] sm:$0xff]  }
 0x719   : > { %3581 = vmatpush3.bf16.msra.mxu1 %v4148_v30  ;;  %3603 = vmatpush3.bf16.msra.mxu0 %v4150_v32  ;;  %v4160_v30 = vld [vmem:[#allocation13 + $0x108] sm:$0xff]   ;;  %v4165_v32 = vld [vmem:[#allocation13 + $0x130] sm:$0xff]  }
 0x71a   : > { %3582 = vmatprep.subr.bf16.mxu1 %v4151_v33  ;;  %3604 = vmatprep.subr.bf16.mxu0 %v4153_v35  ;;  %v1978_v33 = vadd.s32 2, %v5331_v51  ;;  %v1475_v35 = vpack.c.bf16 %v4715_v0, %v5366_v49  ;;  %v4167_v51 = vld [vmem:[#allocation16] sm:$0xff]   ;;  %v4172_v49 = vld [vmem:[#allocation16 + $0x28] sm:$0xff]  }
 0x71c   : > { %vm1982_vm4 = vcmp.lt.s32.totalorder %v1978_v33, 16 }
 0x71d   : > { %3583 = vmatpush3.bf16.msra.mxu1 %v4152_v34  ;;  %3605 = vmatpush3.bf16.msra.mxu0 %v4154_v36  ;;  %v4166_v34 = vld [vmem:[#allocation13 + $0x138] sm:$0xff]   ;;  %vm3456_vm5 = vmpackc.low %vm1982_vm4, %vm4717_vm12  ;;  %v4168_v36 = vld [vmem:[#allocation16 + $0x8] sm:$0xff]  }
 0x71e   : > { %3584 = vmatprep.subr.bf16.mxu1 %v4155_v37  ;;  %3606 = vmatprep.subr.bf16.mxu0 %v4157_v39  ;;  %v4169_v37 = vld [vmem:[#allocation16 + $0x10] sm:$0xff]   ;;  %v4171_v39 = vld [vmem:[#allocation16 + $0x20] sm:$0xff]  }
 0x721   : > { %3585 = vmatpush3.bf16.msra.mxu1 %v4156_v38  ;;  %3607 = vmatpush3.bf16.msra.mxu0 %v4158_v40  ;;  %v4170_v38 = vld [vmem:[#allocation16 + $0x18] sm:$0xff]   ;;  %v4173_v40 = vld [vmem:[#allocation16 + $0x30] sm:$0xff]  }
 0x722   : > { %3783 = vmatprep.subr.bf16.mxu1 %v4715_v0  ;;  %3803 = vmatprep.subr.bf16.mxu0 %v4715_v0 }
 0x7d7   : > { %v3555_v41 = vpop.f32.mrb[8].mxu1  ;;  %v1914_v42 = vpop.f32.mrb[20].mxu0 }
 0x7d8   : > { %v3556_v44 = vpop.f32.mrb[9].mxu1  ;;  %v3781_v45 = vpop.f32.mrb[21].mxu0 }
 0x7d9   : > { %v3557_v46 = vadd.f32 %v3556_v44, %v3555_v41  ;;  %v3558_v47 = vpop.f32.mrb[10].mxu1  ;;  %v1917_v52 = vpop.f32.mrb[22].mxu0  ;;  %v4174_v41 = vld [vmem:[#allocation16 + $0x38] sm:$0xff]  }
 0x7da   : > { %v3559_v53 = vpop.f32.mrb[11].mxu1  ;;  %v3782_v54 = vpop.f32.mrb[23].mxu0  ;;  %v3406_v44 = vld [vmem:[#allocation14] ss:$0 sm:$0xff] }
 0x7db   : > { %v1874_v55 = vadd.f32 %v3557_v46, %v3373_v43  ;;  %v3560_v56 = vadd.f32 %v3559_v53, %v3558_v47 }
 0x7dd   : > { %v1915_v57 = vadd.f32 %v1914_v42, %v1874_v55  ;;  %v1877_v58 = vadd.f32 %v3560_v56, %v3373_v43 }
 0x7df   : > { %v1921_v60 = vmax.f32 %v1915_v57, 0.0  ;;  %v1918_v61 = vadd.f32 %v1917_v52, %v1877_v58 }
 0x7e1   : > { %v1928_v63 = vmul.f32 %v3404_v59, %v1921_v60  ;;  %v1922_v1 = vmax.f32 %v1918_v61, 0.0 }
 0x7e3   : > { %v1935_v4 = vadd.f32 %v3405_v62, %v1928_v63  ;;  %v1929_v5 = vmul.f32 %v3404_v59, %v1922_v1 }
 0x7e5   : > { %v1936_v6 = vadd.f32 %v3405_v62, %v1929_v5  ;;  %v1957_v7 = vrot.slane %v1935_v4, 7  ;;  %v1965_v9 = vrot.slane %v1935_v4, 1  ;;  %v1937_v14 = vrot.slane %v1935_v4, 6 }
 0x7e6   : > { %v1972_v15 = vrot.slane %v1935_v4, 2 }
 0x7e7   : > { %v1958_v10 = vrot.slane %v1936_v6, 7  ;;  %v1966_v11 = vrot.slane %v1936_v6, 1  ;;  %v1938_v12 = vrot.slane %v1936_v6, 6  ;;  %v1964_v13 = vpack.c.bf16 %v1936_v6, %v1935_v4  ;;  %v3459_v4 = vld [vmem:[#allocation14 + $0x1] ss:$0 sm:$0xff] }
 0x7e8   : > { %v1973_v16 = vrot.slane %v1936_v6, 2 }
 0x7e9   : > { %v1959_v17 = vsel %vm1603_vm9, %v1957_v7, %v1958_v10  ;;  %v1960_v18 = vsel %vm1603_vm9, %v1958_v10, %v1957_v7  ;;  %v1967_v19 = vsel %vm1624_vm10, %v1965_v9, %v1966_v11  ;;  %v1968_v20 = vsel %vm1624_vm10, %v1966_v11, %v1965_v9 }
 0x7ea   : > { %v3448_v21 = vpack.c.bf16 %v1959_v17, %v1960_v18  ;;  %v3454_v22 = vpack.c.bf16 %v1968_v20, %v1967_v19  ;;  %v1940_v23 = vsel %vm1939_vm15, %v1937_v14, %v1938_v12  ;;  %v1941_v24 = vsel %vm1939_vm15, %v1938_v12, %v1937_v14  ;;  %v3460_v12 = vld [vmem:[#allocation14 + $0x2] ss:$0 sm:$0xff] }
 0x7eb   : > { %v3451_v26 = vpack.c.bf16 %v1940_v23, %v1941_v24  ;;  %v1975_v27 = vsel %vm1974_vm2, %v1972_v15, %v1973_v16  ;;  %v1976_v28 = vsel %vm1974_vm2, %v1973_v16, %v1972_v15 }
 0x7ec   : > { %3449 = vmatprep.mubr.msk.bf16.mxu1 %vm5373_vm13, %v3448_v21  ;;  %3455 = vmatprep.mubr.msk.bf16.mxu0 %vm5386_vm14, %v3454_v22  ;;  %v3457_v29 = vpack.c.bf16 %v1976_v28, %v1975_v27  ;;  %v2615_v22 = vand.u32 127, %v1485_v48 }
 0x7ed   : > { %3452 = vmatmul.mubr.msk.bf16.vlgmr.msra.gmra.mrb[12].mxu1 %vm3450_vm3, %v3451_v26  ;;  %2391 = vmatmul.mubr.bf16.vlgmr.msra.gmra.mrb[24].mxu0 %v1964_v13 }
 0x7ee   : > { %3784 = vmatpush3.bf16.msra.mxu1 %v4159_v25  ;;  %3799 = vmatprep.mubr.msk.bf16.mxu1 %vm4716_vm0, %v4715_v0  ;;  %vm2616_vm6 = vcmp.lt.s32.totalorder %v2615_v22, 8 }
 0x7ef   : > { %3785 = vmatprep.subr.bf16.mxu1 %v4715_v0  ;;  %3819 = vmatprep.mubr.msk.bf16.mxu0 %vm4716_vm0, %v4715_v0 }
 0x7f0   : > { %3804 = vmatpush3.bf16.msra.mxu0 %v4167_v51 }
 0x7f1   : > { %3805 = vmatprep.subr.bf16.mxu0 %v4715_v0 }
 0x7f2   : > { %3786 = vmatpush3.bf16.msra.mxu1 %v4160_v30 }
 0x7f3   : > { %3787 = vmatprep.subr.bf16.mxu1 %v4715_v0 }
 0x7f4   : > { %3806 = vmatpush3.bf16.msra.mxu0 %v4168_v36 }
 0x7f5   : > { %3807 = vmatprep.subr.bf16.mxu0 %v4715_v0 }
 0x7f6   : > { %3788 = vmatpush3.bf16.msra.mxu1 %v4161_v50 }
 0x7f7   : > { %3789 = vmatprep.subr.bf16.mxu1 %v4715_v0 }
 0x7f8   : > { %3808 = vmatpush3.bf16.msra.mxu0 %v4169_v37 }
 0x7f9   : > { %3809 = vmatprep.subr.bf16.mxu0 %v4715_v0 }
 0x7fa   : > { %3790 = vmatpush3.bf16.msra.mxu1 %v4162_v3 }
 0x7fb   : > { %3791 = vmatprep.subr.bf16.mxu1 %v4715_v0 }
 0x7fc   : > { %3810 = vmatpush3.bf16.msra.mxu0 %v4170_v38 }
 0x7fd   : > { %3811 = vmatprep.subr.bf16.mxu0 %v4715_v0 }
 0x7fe   : > { %3792 = vmatpush3.bf16.msra.mxu1 %v4163_v8 }
 0x7ff   : > { %3793 = vmatprep.subr.bf16.mxu1 %v4715_v0 }
 0x800   : > { %3812 = vmatpush3.bf16.msra.mxu0 %v4171_v39 }
 0x801   : > { %3813 = vmatprep.subr.bf16.mxu0 %v4715_v0 }
 0x802   : > { %3794 = vmatpush3.bf16.msra.mxu1 %v4164_v31 }
 0x803   : > { %3795 = vmatprep.subr.bf16.mxu1 %v4715_v0 }
 0x804   : > { %3814 = vmatpush3.bf16.msra.mxu0 %v4172_v49 }
 0x805   : > { %3815 = vmatprep.subr.bf16.mxu0 %v4715_v0 }
 0x806   : > { %3796 = vmatpush3.bf16.msra.mxu1 %v4165_v32 }
 0x807   : > { %3797 = vmatprep.subr.bf16.mxu1 %v4715_v0 }
 0x808   : > { %3816 = vmatpush3.bf16.msra.mxu0 %v4173_v40  ;;  %v4175_v40 = vld [vmem:[#allocation19] sm:$0xff]  }
 0x809   : > { %3817 = vmatprep.subr.bf16.mxu0 %v4715_v0 }
 0x80a   : > { %3798 = vmatpush3.bf16.msra.mxu1 %v4166_v34 }
 0x80b   : > { %3823 = vmatprep.subr.bf16.mxu1 %v4715_v0 }
 0x80c   : > { %3818 = vmatpush3.bf16.msra.mxu0 %v4174_v41  ;;  %v4176_v41 = vld [vmem:[#allocation19 + $0x8] sm:$0xff]  }
 0x80d   : > { %3800 = vmatmul.mubr.msk.bf16.vlgmr.msra.gmra.mrb[16].mxu1 %vm3456_vm5, %v3457_v29  ;;  %3829 = vmatprep.subr.bf16.mxu0 %v4715_v0 }
 0x80e   : > { %3825 = vmatprep.mubr.msk.bf16.mxu1 %vm4716_vm0, %v4715_v0 }
 0x813   : > { %3824 = vmatpush3.bf16.xpose.msra.mxu1 %v1475_v35 }
 0x814   : > { %3835 = vmatprep.subr.bf16.mxu1 %v4715_v0 }
 0x8c0   : > { %v3586_v42 = vpop.f32.mrb[12].mxu1  ;;  %v3608_v43 = vpop.f32.mrb[24].mxu0 }
 0x8c1   : > { %v3587_v45 = vpop.f32.mrb[13].mxu1  ;;  %v3609_v46 = vpop.f32.mrb[25].mxu0 }
 0x8c2   : > { %v3588_v47 = vadd.f32 %v3587_v45, %v3586_v42  ;;  %v3610_v52 = vadd.f32 %v3609_v46, %v3608_v43  ;;  %v3589_v53 = vpop.f32.mrb[14].mxu1  ;;  %v3611_v54 = vpop.f32.mrb[26].mxu0  ;;  %v4177_v42 = vld [vmem:[#allocation19 + $0x10] sm:$0xff]  }
 0x8c3   : > { %v3590_v55 = vpop.f32.mrb[15].mxu1  ;;  %v3612_v56 = vpop.f32.mrb[27].mxu0 }
 0x8c4   : > { %v2352_v57 = vadd.f32 %v3588_v47, %v3406_v44  ;;  %v3591_v58 = vadd.f32 %v3590_v55, %v3589_v53  ;;  %v3613_v59 = vadd.f32 %v3612_v56, %v3611_v54 }
 0x8c6   : > { %v2355_v60 = vadd.f32 %v3591_v58, %v3406_v44  ;;  %v2393_v61 = vadd.f32 %v3610_v52, %v2352_v57 }
 0x8c8   : > { %v2396_v62 = vadd.f32 %v3613_v59, %v2355_v60  ;;  %v4178_v60 = vld [vmem:[#allocation19 + $0x18] sm:$0xff]  }
 0x8e0   : > { %v2433_v63 = vpop.f32.mrb[16].mxu1 }
 0x8e1   : > { %v2434_v1 = vadd.f32 %v2433_v63, %v2393_v61  ;;  %v3801_v2 = vpop.f32.mrb[17].mxu1  ;;  %v4179_v61 = vld [vmem:[#allocation19 + $0x20] sm:$0xff]   ;;  %v4181_v63 = vld [vmem:[#allocation19 + $0x30] sm:$0xff]  }
 0x8e2   : > { %v2436_v5 = vpop.f32.mrb[18].mxu1  ;;  %v4183_v2 = vld [vmem:[#allocation22] sm:$0xff]  }
 0x8e3   : > { %v2440_v6 = vmax.f32 %v2434_v1, 0.0  ;;  %v2437_v7 = vadd.f32 %v2436_v5, %v2396_v62  ;;  %v3802_v9 = vpop.f32.mrb[19].mxu1  ;;  %v4180_v62 = vld [vmem:[#allocation19 + $0x28] sm:$0xff]   ;;  %v4182_v1 = vld [vmem:[#allocation19 + $0x38] sm:$0xff]  }
 0x8e4   : > { %v4185_v5 = vld [vmem:[#allocation22 + $0x10] sm:$0xff]  }
 0x8e5   : > { %v2447_v10 = vmul.f32 %v3459_v4, %v2440_v6  ;;  %v2441_v11 = vmax.f32 %v2437_v7, 0.0  ;;  %v4186_v6 = vld [vmem:[#allocation22 + $0x18] sm:$0xff]   ;;  %v4187_v7 = vld [vmem:[#allocation22 + $0x20] sm:$0xff]  }
 0x8e7   : > { %v2448_v13 = vmul.f32 %v3459_v4, %v2441_v11  ;;  %v2454_v14 = vadd.f32 %v3460_v12, %v2447_v10  ;;  %v4184_v4 = vld [vmem:[#allocation22 + $0x8] sm:$0xff]  }
 0x8e9   : > { %v2455_v15 = vadd.f32 %v3460_v12, %v2448_v13 }
 0x8eb   : > { %v2456_v16 = vpack.c.bf16 %v2455_v15, %v2454_v14 }
 0x8ed   : > { %3820 = vmatmul.mubr.bf16.vlgmr.msra.gmra.mrb[28].mxu0 %v2456_v16 }
 0x8ee   : > { %3830 = vmatpush3.bf16.msra.mxu0 %v1475_v35  ;;  %3831 = vmatprep.mubr.msk.bf16.mxu0 %vm4716_vm0, %v4715_v0 }
 0x8ef   : > { %3855 = vmatprep.subr.bf16.mxu0 %v4715_v0 }
 0x9c0   : > { %v5447_v17 = vpop.f32.mrb[28].mxu0 }
 0x9c1   : > { %v3821_v18 = vpop.f32.mrb[29].mxu0 }
 0x9c2   : > { %v5449_v19 = vpop.f32.mrb[30].mxu0 }
 0x9c3   : > { %v2562_v20 = vpack.c.bf16 %v5449_v19, %v5447_v17  ;;  %v3822_v21 = vpop.f32.mrb[31].mxu0 }
 0x9c5   : > { %3826 = vmatmul.mubr.bf16.vlgmr.msra.gmra.mrb[20].mxu1 %v2562_v20 }
 0x9c6   : > { %3851 = vmatprep.mubr.msk.bf16.mxu1 %vm4716_vm0, %v4715_v0  ;;  %3836 = vmatpush3.bf16.msra.mxu1 %v4175_v40  ;;  %v2829_v40 = vld [vmem:[#allocation23] sm:$0x1] }
 0x9c7   : > { %3837 = vmatprep.subr.bf16.mxu1 %v4715_v0 }
 0x9ca   : > { %3838 = vmatpush3.bf16.msra.mxu1 %v4176_v41 }
 0x9cb   : > { %3839 = vmatprep.subr.bf16.mxu1 %v4715_v0 }
 0x9ce   : > { %3840 = vmatpush3.bf16.msra.mxu1 %v4177_v42 }
 0x9cf   : > { %3841 = vmatprep.subr.bf16.mxu1 %v4715_v0 }
 0x9d2   : > { %3842 = vmatpush3.bf16.msra.mxu1 %v4178_v60 }
 0x9d3   : > { %3843 = vmatprep.subr.bf16.mxu1 %v4715_v0 }
 0x9d6   : > { %3844 = vmatpush3.bf16.msra.mxu1 %v4179_v61 }
 0x9d7   : > { %3845 = vmatprep.subr.bf16.mxu1 %v4715_v0 }
 0x9da   : > { %3846 = vmatpush3.bf16.msra.mxu1 %v4180_v62 }
 0x9db   : > { %3847 = vmatprep.subr.bf16.mxu1 %v4715_v0 }
 0x9de   : > { %3848 = vmatpush3.bf16.msra.mxu1 %v4181_v63 }
 0x9df   : > { %3849 = vmatprep.subr.bf16.mxu1 %v4715_v0 }
 0x9e2   : > { %3850 = vmatpush3.bf16.msra.mxu1 %v4182_v1 }
 0x9e3   : > { %3875 = vmatprep.subr.bf16.mxu1 %v4715_v0 }
 0xa98   : > { %v2605_v23 = vpop.f32.mrb[20].mxu1 }
 0xa99   : > { %v2612_v24 = vmul.f32 0.17677669, %v2605_v23  ;;  %v3827_v25 = vpop.f32.mrb[21].mxu1 }
 0xa9a   : > { %v2608_v26 = vpop.f32.mrb[22].mxu1  ;;  %v4188_v25 = vld [vmem:[#allocation22 + $0x28] sm:$0xff]  }
 0xa9b   : > { %v2613_v27 = vmul.f32 0.17677669, %v2608_v26  ;;  %v3828_v28 = vpop.f32.mrb[23].mxu1  ;;  %v2617_v29 = vsel %vm2616_vm6, %v2612_v24, -1e+30  ;;  %v4191_v26 = vld [vmem:[#allocation25] sm:$0xff]  }
 0xa9c   : > { %2619 = vmax.xlane.f32.xlu1 %v2617_v29  ;;  %v4193_v28 = vld [vmem:[#allocation25 + $0x10] sm:$0xff]  }
 0xa9d   : > { %v2618_v30 = vsel %vm2616_vm6, %v2613_v27, -1e+30  ;;  %v4192_v27 = vld [vmem:[#allocation25 + $0x8] sm:$0xff]  }
 0xaa0   : > { %2621 = vmax.xlane.f32.xlu1 %v2618_v30 }
 0xb29   : > { %v2620_v50 = vpop.xlane.xlu1 %2619 }
 0xb2d   : > { %v2622_v3 = vpop.xlane.xlu1 %2621 }
 0xb2e   : > { %v2623_v8 = vmax.f32 %v2620_v50, %v2622_v3  ;;  %v2718_v50 = vld [vmem:[#allocation20] sm:$0x1] }
 0xb30   : > { %v2624_v31 = vrot.slane %v2623_v8, 4 }
 0xb32   : > { %v2625_v32 = vmax.f32 %v2623_v8, %v2624_v31 }
 0xb34   : > { %v2626_v33 = vrot.slane %v2625_v32, 2 }
 0xb36   : > { %v2627_v34 = vmax.f32 %v2625_v32, %v2626_v33  ;;  %v2808_v32 = vld [vmem:[#allocation20 + $0x1] sm:$0x1] }
 0xb38   : > { %v2628_v35 = vrot.slane %v2627_v34, 1 }
 0xb3a   : > { %v2629_v48 = vmax.f32 %v2627_v34, %v2628_v35 }
 0xb3c   : > { %v2630_v51 = vsub.f32 %v2617_v29, %v2629_v48  ;;  %v2631_v36 = vsub.f32 %v2618_v30, %v2629_v48  ;;  %v4194_v29 = vld [vmem:[#allocation25 + $0x18] sm:$0xff]   ;;  %v4195_v30 = vld [vmem:[#allocation25 + $0x20] sm:$0xff]  }
 0xb3d   : > { %v2810_v48 = vld [vmem:[#allocation20 + $0x2] sm:$0x1] }
 0xb3e   : > { %v2632_v37 = vmul.f32 1.442695, %v2630_v51  ;;  %v2634_v38 = vmul.f32 1.442695, %v2631_v36 }
 0xb40   : > { %4199 = vpow2.f32 %v2632_v37 }
 0xb41   : > { %4201 = vpow2.f32 %v2634_v38  ;;  %v4196_v38 = vld [vmem:[#allocation25 + $0x28] sm:$0xff]  }
 0xb4a   : > { %v4200_v39 = vpop.eup %4199 }
 0xb4b   : > { %2636 = vadd.xlane.f32.xlu1 %v4200_v39  ;;  %v4202_v49 = vpop.eup %4201 }
 0xb4f   : > { %2638 = vadd.xlane.f32.xlu1 %v4202_v49 }
 0xbd8   : > { %v2637_v43 = vpop.xlane.xlu1 %2636 }
 0xbdc   : > { %v2639_v44 = vpop.xlane.xlu1 %2638 }
 0xbdd   : > { %v2640_v45 = vadd.f32 %v2639_v44, %v2637_v43  ;;  %v2919_v44 = vld [vmem:[#allocation23 + $0x1] sm:$0x1] }
 0xbdf   : > { %v2641_v46 = vrot.slane %v2640_v45, 4 }
 0xbe1   : > { %v2642_v47 = vadd.f32 %v2641_v46, %v2640_v45 }
 0xbe3   : > { %v2643_v52 = vrot.slane %v2642_v47, 2 }
 0xbe5   : > { %v2644_v53 = vadd.f32 %v2643_v52, %v2642_v47  ;;  %v2921_v52 = vld [vmem:[#allocation23 + $0x2] sm:$0x1] }
 0xbe7   : > { %v2645_v54 = vrot.slane %v2644_v53, 1 }
 0xbe9   : > { %v2646_v55 = vadd.f32 %v2645_v54, %v2644_v53 }
 0xbeb   : > { %4203 = vrcp.f32 %v2646_v55 }
 0xbf5   : > { %v4204_v56 = vpop.eup %4203 }
 0xbf6   : > { %v2648_v57 = vmul.f32 %v4204_v56, %v4200_v39  ;;  %v2649_v58 = vmul.f32 %v4204_v56, %v4202_v49  ;;  %v4197_v39 = vld [vmem:[#allocation25 + $0x30] sm:$0xff]   ;;  %v4198_v49 = vld [vmem:[#allocation25 + $0x38] sm:$0xff]   ;;  %v2940_v56 = vld [vmem:[#allocation26] sm:$0x1] }
 0xbf8   : > { %v2650_v59 = vpack.c.bf16 %v2649_v58, %v2648_v57  ;;  %3030 = vst [vmem:[%s941_s23] sm:$0xff] %v2648_v57  ;;  %3031 = vst [vmem:[%s941_s23 + $0x8] sm:$0xff] %v2649_v58 }
 0xbfa   : > { %3832 = vmatmul.mubr.bf16.vlgmr.msra.gmra.mrb[32].mxu0 %v2650_v59 }
 0xbfb   : > { %3871 = vmatprep.mubr.msk.bf16.mxu0 %vm4716_vm0, %v4715_v0  ;;  %3856 = vmatpush3.bf16.msra.mxu0 %v4183_v2 }
 0xbfc   : > { %3857 = vmatprep.subr.bf16.mxu0 %v4715_v0 }
 0xbff   : > { %3858 = vmatpush3.bf16.msra.mxu0 %v4184_v4 }
 0xc00   : > { %3859 = vmatprep.subr.bf16.mxu0 %v4715_v0 }
 0xc03   : > { %3860 = vmatpush3.bf16.msra.mxu0 %v4185_v5 }
 0xc04   : > { %3861 = vmatprep.subr.bf16.mxu0 %v4715_v0 }
 0xc07   : > { %3862 = vmatpush3.bf16.msra.mxu0 %v4186_v6 }
 0xc08   : > { %3863 = vmatprep.subr.bf16.mxu0 %v4715_v0 }
 0xc0b   : > { %3864 = vmatpush3.bf16.msra.mxu0 %v4187_v7 }
 0xc0c   : > { %3865 = vmatprep.subr.bf16.mxu0 %v4715_v0 }
 0xc0f   : > { %3866 = vmatpush3.bf16.msra.mxu0 %v4188_v25 }
 0xc10   : > { %3867 = vmatprep.subr.bf16.mxu0 %v4715_v0 }
 0xccd   : > { %v2685_v9 = vpop.f32.mrb[32].mxu0 }
 0xcce   : > { %v2692_v10 = vmul.f32 %v2685_v9, %v5447_v17  ;;  %v3833_v11 = vpop.f32.mrb[33].mxu0  ;;  %v4189_v17 = vld [vmem:[#allocation22 + $0x30] sm:$0xff]  }
 0xccf   : > { %v2688_v12 = vpop.f32.mrb[34].mxu0  ;;  %3868 = vmatpush3.bf16.msra.mxu0 %v4189_v17 }
 0xcd0   : > { %v2693_v13 = vmul.f32 %v2688_v12, %v5449_v19  ;;  %v3834_v14 = vpop.f32.mrb[35].mxu0  ;;  %3869 = vmatprep.subr.bf16.mxu0 %v4715_v0  ;;  %v4190_v19 = vld [vmem:[#allocation22 + $0x38] sm:$0xff]  }
 0xcd2   : > { %v2694_v15 = vadd.f32 %v2693_v13, %v2692_v10 }
 0xcd3   : > { %3870 = vmatpush3.bf16.msra.mxu0 %v4190_v19 }
 0xcd4   : > { %v2695_v16 = vrot.slane %v2694_v15, 4 }
 0xcd6   : > { %v2696_v18 = vadd.f32 %v2695_v16, %v2694_v15 }
 0xcd8   : > { %v2697_v20 = vrot.slane %v2696_v18, 2 }
 0xcda   : > { %v2698_v21 = vadd.f32 %v2697_v20, %v2696_v18 }
 0xcdc   : > { %v2699_v22 = vrot.slane %v2698_v21, 1 }
 0xcde   : > { %v2700_v23 = vadd.f32 %v2699_v22, %v2698_v21 }
 0xce0   : > { %v2701_v24 = vpack.c.bf16 %v2700_v23, %v2700_v23 }
 0xce2   : > { %3852 = vmatmul.mubr.bf16.vlgmr.msra.gmra.mrb[24].mxu1 %v2701_v24 }
 0xce3   : > { %3891 = vmatprep.mubr.msk.bf16.mxu1 %vm4716_vm0, %v4715_v0  ;;  %3876 = vmatpush3.bf16.msra.mxu1 %v4191_v26 }
 0xce4   : > { %3877 = vmatprep.subr.bf16.mxu1 %v4715_v0 }
 0xce7   : > { %3878 = vmatpush3.bf16.msra.mxu1 %v4192_v27 }
 0xce8   : > { %3879 = vmatprep.subr.bf16.mxu1 %v4715_v0 }
 0xceb   : > { %3880 = vmatpush3.bf16.msra.mxu1 %v4193_v28 }
 0xcec   : > { %3881 = vmatprep.subr.bf16.mxu1 %v4715_v0 }
 0xcef   : > { %3882 = vmatpush3.bf16.msra.mxu1 %v4194_v29 }
 0xcf0   : > { %3883 = vmatprep.subr.bf16.mxu1 %v4715_v0 }
 0xcf3   : > { %3884 = vmatpush3.bf16.msra.mxu1 %v4195_v30 }
 0xcf4   : > { %3885 = vmatprep.subr.bf16.mxu1 %v4715_v0 }
 0xcf7   : > { %3886 = vmatpush3.bf16.msra.mxu1 %v4196_v38 }
 0xcf8   : > { %3887 = vmatprep.subr.bf16.mxu1 %v4715_v0 }
 0xcfb   : > { %3888 = vmatpush3.bf16.msra.mxu1 %v4197_v39 }
 0xcfc   : > { %3889 = vmatprep.subr.bf16.mxu1 %v4715_v0 }
 0xcff   : > { %3890 = vmatpush3.bf16.msra.mxu1 %v4198_v49 }
 0xdb5   : > { %v2801_v3 = vpop.f32.mrb[24].mxu1 }
 0xdb6   : > { %v2802_v8 = vadd.f32 %v2801_v3, %v2718_v50  ;;  %v3853_v31 = vpop.f32.mrb[25].mxu1 }
 0xdb7   : > { %v2804_v33 = vpop.f32.mrb[26].mxu1 }
 0xdb8   : > { %v2807_v34 = vmax.f32 %v2802_v8, 0.0  ;;  %v3854_v35 = vpop.f32.mrb[27].mxu1 }
 0xdba   : > { %v2809_v51 = vmul.f32 %v2808_v32, %v2807_v34 }
 0xdbc   : > { %v2811_v36 = vadd.f32 %v2810_v48, %v2809_v51 }
 0xdbe   : > { %v2812_v37 = vpack.c.bf16 %v2811_v36, %v2811_v36 }
 0xdc0   : > { %3872 = vmatmul.mubr.bf16.vlgmr.msra.gmra.mrb[36].mxu0 %v2812_v37 }
 0xe93   : > { %v2912_v41 = vpop.f32.mrb[36].mxu0 }
 0xe94   : > { %v2913_v42 = vadd.f32 %v2912_v41, %v2829_v40  ;;  %v3873_v43 = vpop.f32.mrb[37].mxu0 }
 0xe95   : > { %v2915_v45 = vpop.f32.mrb[38].mxu0 }
 0xe96   : > { %v2918_v46 = vmax.f32 %v2913_v42, 0.0  ;;  %v3874_v47 = vpop.f32.mrb[39].mxu0 }
 0xe98   : > { %v2920_v53 = vmul.f32 %v2919_v44, %v2918_v46 }
 0xe9a   : > { %v2922_v54 = vadd.f32 %v2921_v52, %v2920_v53 }
 0xe9c   : > { %v2923_v55 = vpack.c.bf16 %v2922_v54, %v2922_v54 }
 0xe9e   : > { %3892 = vmatmul.mubr.bf16.vlgmr.msra.gmra.mrb[28].mxu1 %v2923_v55 }
 0xf71   : > { %v3023_v0 = vpop.f32.mrb[28].mxu1 }
 0xf72   : > { %v3024_v57 = vadd.f32 %v3023_v0, %v2940_v56  ;;  %v3893_v58 = vpop.f32.mrb[29].mxu1 }
 0xf73   : > { %v3026_v59 = vpop.f32.mrb[30].mxu1 }
 0xf74   : > { %3029 = vst [vmem:[%s936_s25] sm:$0x1] %v3024_v57  ;;  %v3894_v60 = vpop.f32.mrb[31].mxu1 }
 0xf75 PF: > { %s5580_s6 = sld [smem:[#allocation37_spill]] }
 0xf7b   : > { %s42_s3 = sadd.s32 1, %s5580_s6  }
 0xf7c   : > { %p39_p5 = scmp.ge.s32.totalorder %s42_s3, 4  }
 0xf7e   :  { %41 = sbr.rel (!%p39_p5) target bundleno = 21 (0x15), region = 217 }
 0xf85   :  { %3065 = vsyncpa [#allocation4], 1 }
 0xf86   :  { %3067 = vsyncpa [#allocation4 + $0x1], 1 }
 0xf87   :  { %3068 = vsyncpa [#allocation6], 1 }
 0xf88   :  { %3069 = vsyncpa [#allocation9], 1 }
 0xf89   :  { %3070 = vsyncpa [#allocation12], 1 }
 0xf8a   :  { %3071 = vsyncpa [#allocation15], 1 }
 0xf8b   :  { %3072 = vsyncpa [#allocation18], 1 }
 0xf8c   :  { %3073 = vsyncpa [#allocation21], 1 }
 0xf8d   :  { %3074 = vsyncpa [#allocation24], 1 }
 0xf8e   :  { %3075 = vsyncpa [#allocation27], 1 }

</bundles_post_ra>
